<compile_context>
chip_gen: v7x
topology: tpu7x:2x2x1
jax: 0.10.0
libtpu: 0.0.40
codegen_flags: <defaults>
</compile_context>

<pallas_src>
import functools
import numpy as np

import jax
import jax.numpy as jnp
from jax.experimental import pallas as pl
from jax.experimental.pallas import tpu as pltpu

EMB = 32
NUM_LAYERS = 2


def _mish_ref(x):
    # reference formulation: torch.nn.functional.mish = x * tanh(softplus(x))
    return x * jnp.tanh(jnp.log1p(jnp.exp(x)))


def _mish(x):
    # mish(x) = x * tanh(softplus(x)) = x * (1 - 2 / (e^2 + 2e + 2)),  e = exp(x)
    # One EUP exp + one exact divide.  Large x: e -> inf -> d -> inf -> 2/d -> 0 -> mish -> x
    # (no inf/inf, no NaN).  Large-negative x: factor -> e, absolute error ~ ulp(1) only.
    e = jnp.exp(x)
    d = e * (e + 2.0) + 2.0
    return x * (1.0 - 2.0 / d)


# ----------------------------------------------------------------------------
# Fused kernel: one grid step == one message-passing layer.
#   out_ref holds the node embeddings and is resident in VMEM across the layer axis.
# ----------------------------------------------------------------------------
def _fused_forward_kernel(meta, idx_col_ref, idx_row_ref, *refs):
    emb = meta['emb']
    n_pad = meta['n_pad']
    m_total = meta['m_total']
    rels = meta['rels']                        # tuple of (arity, t_pad, flat_offset)

    n_rel = len(rels)
    rel_refs = refs[:4 * n_rel]                # per relation: wi(bf16), bi(f32), wo(bf16), bo(f32)
    uwi_ref, ubi_ref, uwo_ref, ubo_ref = refs[4 * n_rel:4 * n_rel + 4]
    out_ref = refs[4 * n_rel + 4]              # (N_pad, E) f32 node embeddings (VMEM-resident)
    ohg_ref = refs[4 * n_rel + 5]              # (M_total, N_pad) bf16 gather one-hot (layer-invariant)
    ohs_ref = refs[4 * n_rel + 6]              # (N_pad, M_total) bf16 scatter one-hot (layer-invariant)
    gath_ref = refs[4 * n_rel + 7]             # (M_total, E) f32 gathered embeddings
    msg_ref = refs[4 * n_rel + 8]              # (M_total, E) f32 slot-major residual messages

    layer = pl.program_id(0)

    @pl.when(layer == 0)
    def _init():
        # torch.zeros initial node embeddings
        out_ref[...] = jnp.zeros_like(out_ref)
        # One-hots depend only on the constant relation indices -> build once per forward,
        # persist in scratch, reuse for every layer's gather and merged scatter matmul.
        iota_n = jax.lax.broadcasted_iota(jnp.int32, (m_total, n_pad), 1)
        ohg_ref[...] = (idx_col_ref[...] == iota_n).astype(jnp.bfloat16)     # exact 0/1
        iota_m = jax.lax.broadcasted_iota(jnp.int32, (n_pad, m_total), 0)
        ohs_ref[...] = (idx_row_ref[...] == iota_m).astype(jnp.bfloat16)     # exact 0/1

    # ---- gather: one (M_total, N_pad) x (N_pad, E) MXU matmul ----
    gath_ref[...] = jnp.dot(ohg_ref[...], out_ref[...].astype(jnp.bfloat16),
                            preferred_element_type=jnp.float32)

    # ---- per-relation MLPs; residual messages land slot-major in msg_ref (8-row aligned) ----
    for r, (arity, t_pad, off) in enumerate(rels):
        wi = rel_refs[4 * r + 0][...]          # (A*E, A*E) bf16
        bi = rel_refs[4 * r + 1][...]          # (1, A*E) f32
        wo = rel_refs[4 * r + 2][...]          # (A*E, A*E) bf16
        bo = rel_refs[4 * r + 3][...]          # (1, A*E) f32

        slots = [gath_ref[pl.ds(off + a * t_pad, t_pad), :] for a in range(arity)]
        g_blk = slots[0] if arity == 1 else jnp.concatenate(slots, axis=1)   # (t_pad, A*E)

        pre = jnp.dot(g_blk.astype(jnp.bfloat16), wi,
                      preferred_element_type=jnp.float32) + bi
        y = jnp.dot(_mish(pre).astype(jnp.bfloat16), wo,
                    preferred_element_type=jnp.float32) + bo
        m_blk = g_blk + y                      # residual message, (t_pad, A*E)

        for a in range(arity):
            msg_ref[pl.ds(off + a * t_pad, t_pad), :] = m_blk[:, a * emb:(a + 1) * emb]

    # ---- merged scatter-add (index_add_): ONE long-K matmul over all relations/slots ----
    # sum_msg[n, e] = sum_m onehot[n, m] * msg[m, e]; pad rows have all-zero one-hot columns.
    sum_msg = jnp.dot(ohs_ref[...], msg_ref[...].astype(jnp.bfloat16),
                      preferred_element_type=jnp.float32)                     # (N_pad, E)

    # ---- update MLP on cat((sum_msg, nodes), 1): single K=2E matmul ----
    nodes = out_ref[...]
    cat_u = jnp.concatenate([sum_msg, nodes], axis=1).astype(jnp.bfloat16)    # (N_pad, 2E)
    pre_u = jnp.dot(cat_u, uwi_ref[...], preferred_element_type=jnp.float32) + ubi_ref[...]
    upd = jnp.dot(_mish(pre_u).astype(jnp.bfloat16), uwo_ref[...],
                  preferred_element_type=jnp.float32) + ubo_ref[...]
    out_ref[...] = nodes + upd                 # residual folded into the single full-tile store


# ----------------------------------------------------------------------------
# Module forward (SumRelationMessagePassing path) — one pallas_call total.
# ----------------------------------------------------------------------------
def relational_mp_forward(params, relations, object_indices, node_sizes,
                          random_readout=False, emb=EMB, num_layers=NUM_LAYERS):
    del object_indices  # only used when random_initialization=True
    assert not random_readout  # TODO(synk): random_readout uses host-side randint; not implemented
    n_nodes = int(np.sum(np.asarray(node_sizes)))
    n_pad = -(-n_nodes // 8) * 8               # sublane-aligned scatter/update target

    rel_names = [n for n in sorted(params['relations'].keys()) if n in relations]

    # Slot-major flat index layout; every relation/slot row range padded to a multiple of 8.
    # Pad rows carry index -1: their gather one-hot row and scatter one-hot column are all-zero,
    # so they gather zeros and contribute nothing to sum_msg.
    idx_pieces, rels_meta, off = [], [], 0
    for name in rel_names:
        arity = params['relations'][name]['arity']
        vals = np.asarray(relations[name], dtype=np.int32).reshape(-1, arity)  # (T, A) tuple-major
        t = vals.shape[0]
        if t == 0:
            continue
        t_pad = -(-t // 8) * 8
        padded = np.full((arity, t_pad), -1, dtype=np.int32)
        padded[:, :t] = vals.T                                                 # slot-major
        idx_pieces.append(padded.reshape(-1))
        rels_meta.append((name, arity, t_pad, off))
        off += arity * t_pad
    m_total = off
    idx_flat = np.concatenate(idx_pieces).astype(np.int32)
    idx_col = jnp.asarray(idx_flat.reshape(m_total, 1))   # sublane form (gather one-hot)
    idx_row = jnp.asarray(idx_flat.reshape(1, m_total))   # lane form (scatter one-hot)

    # Weights go in as bf16 MXU operands; biases stay f32 (added post-accumulation).
    args = [idx_col, idx_row]
    for name, *_ in rels_meta:
        rp = params['relations'][name]
        args += [rp['wi'].astype(jnp.bfloat16), rp['bi'],
                 rp['wo'].astype(jnp.bfloat16), rp['bo']]
    up = params['update']
    args += [up['wi'].astype(jnp.bfloat16), up['bi'],
             up['wo'].astype(jnp.bfloat16), up['bo']]

    meta = dict(emb=emb, n_pad=n_pad, m_total=m_total,
                rels=tuple((a, t, o) for _, a, t, o in rels_meta))
    kern = functools.partial(_fused_forward_kernel, meta)

    def _resident(arr):
        # Full-array block with a constant index map: DMA'd once, resident in VMEM for all layers.
        return pl.BlockSpec(arr.shape, lambda l, nd=arr.ndim: (0,) * nd)

    # Explicit VMEM budget: resident inputs (double-buffered by the BlockSpec pipeline),
    # resident output, one-hot / gather / message scratch slabs, plus headroom.
    in_bytes = sum(int(a.size) * a.dtype.itemsize for a in args)
    scratch_bytes = (m_total * n_pad * 2) + (n_pad * m_total * 2) + 2 * (m_total * emb * 4)
    out_bytes = n_pad * emb * 4
    vmem_limit = int(min(max(4 * (2 * in_bytes + 2 * out_bytes + scratch_bytes), 8 << 20),
                         64 << 20))

    out = pl.pallas_call(
        kern,
        out_shape=jax.ShapeDtypeStruct((n_pad, emb), jnp.float32),
        grid=(num_layers,),
        in_specs=[_resident(a) for a in args],
        out_specs=pl.BlockSpec((n_pad, emb), lambda l: (0, 0)),
        scratch_shapes=[pltpu.VMEM((m_total, n_pad), jnp.bfloat16),   # gather one-hot
                        pltpu.VMEM((n_pad, m_total), jnp.bfloat16),   # scatter one-hot
                        pltpu.VMEM((m_total, emb), jnp.float32),      # gathered embeddings
                        pltpu.VMEM((m_total, emb), jnp.float32)],     # slot-major messages
        compiler_params=pltpu.CompilerParams(
            dimension_semantics=("arbitrary",),
            vmem_limit_bytes=vmem_limit),
        # TODO(synk): for v7x, add a leading "parallel" node-tile grid axis (2nd TensorCore) and
        #             tile / DMA-gather the (M_total, N) one-hot once N reaches the thousands.
        # TODO(synk): batch same-arity relations against a block-diagonal weight to widen the
        #             per-relation MXU tiles further on v6e/v7x's 256-wide MXU.
    )(*args)
    return out[:n_nodes], None


# ----------------------------------------------------------------------------
# Parameter init (deterministic, synthetic "domain": relation name -> arity)
# ----------------------------------------------------------------------------
def init_params(key, relation_arities, emb):
    def linear(k, fan_in, fan_out):
        k1, k2 = jax.random.split(k)
        w = jax.random.normal(k1, (fan_in, fan_out), jnp.float32) * 0.1  # pre-transposed (in, out)
        b = jax.random.normal(k2, (1, fan_out), jnp.float32) * 0.1
        return w, b

    params = {'relations': {}}
    for name in sorted(relation_arities.keys()):
        arity = relation_arities[name]
        key, k1, k2 = jax.random.split(key, 3)
        wi, bi = linear(k1, arity * emb, arity * emb)
        wo, bo = linear(k2, arity * emb, arity * emb)
        params['relations'][name] = dict(wi=wi, bi=bi, wo=wo, bo=bo, arity=arity)

    key, k1, k2 = jax.random.split(key, 3)
    wi, bi = linear(k1, 2 * emb, 2 * emb)
    wo, bo = linear(k2, 2 * emb, emb)
    params['update'] = dict(wi=wi, bi=bi, wo=wo, bo=bo)
    return params


# ----------------------------------------------------------------------------
# Pure-JAX f32 reference (mirrors the PyTorch forward exactly)
# ----------------------------------------------------------------------------
def reference_forward(params, relations, node_sizes, emb=EMB, num_layers=NUM_LAYERS):
    n_nodes = int(np.sum(np.asarray(node_sizes)))
    x = jnp.zeros((n_nodes, emb), jnp.float32)
    for _ in range(num_layers):
        msgs_list, idx_list = [], []
        for name in sorted(params['relations'].keys()):
            if name not in relations:
                continue
            rp = params['relations'][name]
            arity = rp['arity']
            rel_vals = relations[name].astype(jnp.int32)
            gathered = x[rel_vals].reshape(-1, arity * emb)
            h = _mish_ref(gathered @ rp['wi'] + rp['bi'])
            y = h @ rp['wo'] + rp['bo']
            msgs_list.append((gathered + y).reshape(-1, emb))
            idx_list.append(rel_vals)
        all_msgs = jnp.concatenate(msgs_list, axis=0)
        all_idx = jnp.concatenate(idx_list, axis=0)
        sum_msg = jnp.zeros((n_nodes, emb), jnp.float32).at[all_idx].add(all_msgs)
        up = params['update']
        pre = jnp.concatenate([sum_msg, x], axis=1) @ up['wi'] + up['bi']
        x = x + (_mish_ref(pre) @ up['wo'] + up['bo'])
    return x, None


if __name__ == "__main__":
    key = jax.random.PRNGKey(0)

    # synthetic "domain": relation name -> arity (predicates + one action with arity 1 + 1)
    relation_arities = {
        'relation_clear': 1,
        'relation_on': 2,
        'action_0': 2,
    }

    # problem instance: 2 graphs with 10 and 14 nodes
    node_sizes = jnp.array([10, 14], dtype=jnp.int32)
    n_nodes = int(np.sum(np.asarray(node_sizes)))
    object_indices = jnp.arange(n_nodes, dtype=jnp.int32)  # unused (random_initialization=False)

    key, kp, k1, k2, k3 = jax.random.split(key, 5)
    params = init_params(kp, relation_arities, EMB)

    relations = {
        'relation_clear': jax.random.randint(k1, (8 * 1,), 0, n_nodes, dtype=jnp.int32),
        'relation_on':    jax.random.randint(k2, (6 * 2,), 0, n_nodes, dtype=jnp.int32),
        'action_0':       jax.random.randint(k3, (5 * 2,), 0, n_nodes, dtype=jnp.int32),
    }

    out, rand_out = relational_mp_forward(params, relations, object_indices,
                                          node_sizes, random_readout=False)
    out = jax.block_until_ready(out)
    assert rand_out is None
    assert out.shape == (n_nodes, EMB) and out.dtype == jnp.float32
    assert bool(jnp.all(jnp.isfinite(out)))

    ref, _ = reference_forward(params, relations, node_sizes)
    ref = jax.block_until_ready(ref)
    # Tolerance sized for bf16 MXU operands (f32 accumulation) over 2 layers vs a pure-f32 reference.
    np.testing.assert_allclose(np.asarray(out), np.asarray(ref), rtol=2e-2, atol=1e-2)

    print("KERNEL_OK")
</pallas_src>

<mosaic_0001>
module attributes {stable_mosaic.version = 11 : i64} {
  func.func @_fused_forward_kernel(%arg0: i32, %arg1: memref<40x1xi32, #tpu.memory_space<vmem>>, %arg2: memref<1x40xi32, #tpu.memory_space<vmem>>, %arg3: memref<64x64xbf16, #tpu.memory_space<vmem>>, %arg4: memref<1x64xf32, #tpu.memory_space<vmem>>, %arg5: memref<64x64xbf16, #tpu.memory_space<vmem>>, %arg6: memref<1x64xf32, #tpu.memory_space<vmem>>, %arg7: memref<32x32xbf16, #tpu.memory_space<vmem>>, %arg8: memref<1x32xf32, #tpu.memory_space<vmem>>, %arg9: memref<32x32xbf16, #tpu.memory_space<vmem>>, %arg10: memref<1x32xf32, #tpu.memory_space<vmem>>, %arg11: memref<64x64xbf16, #tpu.memory_space<vmem>>, %arg12: memref<1x64xf32, #tpu.memory_space<vmem>>, %arg13: memref<64x64xbf16, #tpu.memory_space<vmem>>, %arg14: memref<1x64xf32, #tpu.memory_space<vmem>>, %arg15: memref<64x64xbf16, #tpu.memory_space<vmem>>, %arg16: memref<1x64xf32, #tpu.memory_space<vmem>>, %arg17: memref<64x32xbf16, #tpu.memory_space<vmem>>, %arg18: memref<1x32xf32, #tpu.memory_space<vmem>>, %arg19: memref<24x32xf32, #tpu.memory_space<vmem>>, %arg20: memref<40x24xbf16, #tpu.memory_space<vmem>>, %arg21: memref<24x40xbf16, #tpu.memory_space<vmem>>, %arg22: memref<40x32xf32, #tpu.memory_space<vmem>>, %arg23: memref<40x32xf32, #tpu.memory_space<vmem>>) attributes {dimension_semantics = [#tpu.dimension_semantics<arbitrary>], iteration_bounds = array<i64: 2>, scalar_prefetch = 0 : i64, scratch_operands = 4 : i64, tpu.core_type = #tpu.core_type<tc>, window_params = [{pipeline_mode = #tpu.pipeline_mode<synchronous>, transform_indices = @transform_0, window_bounds = array<i64: 40, 1>}, {pipeline_mode = #tpu.pipeline_mode<synchronous>, transform_indices = @transform_1, window_bounds = array<i64: 1, 40>}, {pipeline_mode = #tpu.pipeline_mode<synchronous>, transform_indices = @transform_2, window_bounds = array<i64: 64, 64>}, {pipeline_mode = #tpu.pipeline_mode<synchronous>, transform_indices = @transform_3, window_bounds = array<i64: 1, 64>}, {pipeline_mode = #tpu.pipeline_mode<synchronous>, transform_indices = @transform_4, window_bounds = array<i64: 64, 64>}, {pipeline_mode = #tpu.pipeline_mode<synchronous>, transform_indices = @transform_5, window_bounds = array<i64: 1, 64>}, {pipeline_mode = #tpu.pipeline_mode<synchronous>, transform_indices = @transform_6, window_bounds = array<i64: 32, 32>}, {pipeline_mode = #tpu.pipeline_mode<synchronous>, transform_indices = @transform_7, window_bounds = array<i64: 1, 32>}, {pipeline_mode = #tpu.pipeline_mode<synchronous>, transform_indices = @transform_8, window_bounds = array<i64: 32, 32>}, {pipeline_mode = #tpu.pipeline_mode<synchronous>, transform_indices = @transform_9, window_bounds = array<i64: 1, 32>}, {pipeline_mode = #tpu.pipeline_mode<synchronous>, transform_indices = @transform_10, window_bounds = array<i64: 64, 64>}, {pipeline_mode = #tpu.pipeline_mode<synchronous>, transform_indices = @transform_11, window_bounds = array<i64: 1, 64>}, {pipeline_mode = #tpu.pipeline_mode<synchronous>, transform_indices = @transform_12, window_bounds = array<i64: 64, 64>}, {pipeline_mode = #tpu.pipeline_mode<synchronous>, transform_indices = @transform_13, window_bounds = array<i64: 1, 64>}, {pipeline_mode = #tpu.pipeline_mode<synchronous>, transform_indices = @transform_14, window_bounds = array<i64: 64, 64>}, {pipeline_mode = #tpu.pipeline_mode<synchronous>, transform_indices = @transform_15, window_bounds = array<i64: 1, 64>}, {pipeline_mode = #tpu.pipeline_mode<synchronous>, transform_indices = @transform_16, window_bounds = array<i64: 64, 32>}, {pipeline_mode = #tpu.pipeline_mode<synchronous>, transform_indices = @transform_17, window_bounds = array<i64: 1, 32>}, {pipeline_mode = #tpu.pipeline_mode<synchronous>, transform_indices = @transform_18, window_bounds = array<i64: 24, 32>}]} {
    %c0_i32 = arith.constant 0 : i32
    %0 = arith.cmpi eq, %arg0, %c0_i32 : i32
    %1 = arith.extui %0 : i1 to i32
    %c0_i32_0 = arith.constant 0 : i32
    %2 = arith.cmpi ne, %1, %c0_i32_0 : i32
    scf.if %2 {
      %cst_87 = arith.constant 0.000000e+00 : f32
      %127 = vector.broadcast %cst_87 : f32 to vector<24x32xf32>
      %c0_88 = arith.constant 0 : index
      %c0_89 = arith.constant 0 : index
      %128 = vector.load %arg19[%c0_88, %c0_89] : memref<24x32xf32, #tpu.memory_space<vmem>>, vector<24x32xf32>
      tpu.vector_store %arg19[%c0_88, %c0_89], %127 {strides = array<i32>} : memref<24x32xf32, #tpu.memory_space<vmem>>, vector<24x32xf32>,
      %129 = tpu.iota {dimensions = array<i32: 1>} : vector<40x24xi32>
      %c0_90 = arith.constant 0 : index
      %c0_91 = arith.constant 0 : index
      %130 = vector.load %arg1[%c0_90, %c0_91] : memref<40x1xi32, #tpu.memory_space<vmem>>, vector<40x1xi32>
      %131 = vector.broadcast %130 : vector<40x1xi32> to vector<40x24xi32>
      %132 = arith.cmpi eq, %131, %129 : vector<40x24xi32>
      %133 = arith.extui %132 : vector<40x24xi1> to vector<40x24xi32>
      %134 = arith.sitofp %133 : vector<40x24xi32> to vector<40x24xf32>
      %135 = arith.truncf %134 : vector<40x24xf32> to vector<40x24xbf16>
      %c0_92 = arith.constant 0 : index
      %c0_93 = arith.constant 0 : index
      %136 = vector.load %arg20[%c0_92, %c0_93] : memref<40x24xbf16, #tpu.memory_space<vmem>>, vector<40x24xbf16>
      tpu.vector_store %arg20[%c0_92, %c0_93], %135 {strides = array<i32>} : memref<40x24xbf16, #tpu.memory_space<vmem>>, vector<40x24xbf16>,
      %137 = tpu.iota {dimensions = array<i32: 0>} : vector<24x40xi32>
      %c0_94 = arith.constant 0 : index
      %c0_95 = arith.constant 0 : index
      %138 = vector.load %arg2[%c0_94, %c0_95] : memref<1x40xi32, #tpu.memory_space<vmem>>, vector<1x40xi32>
      %139 = vector.broadcast %138 : vector<1x40xi32> to vector<24x40xi32>
      %140 = arith.cmpi eq, %139, %137 : vector<24x40xi32>
      %141 = arith.extui %140 : vector<24x40xi1> to vector<24x40xi32>
      %142 = arith.sitofp %141 : vector<24x40xi32> to vector<24x40xf32>
      %143 = arith.truncf %142 : vector<24x40xf32> to vector<24x40xbf16>
      %c0_96 = arith.constant 0 : index
      %c0_97 = arith.constant 0 : index
      %144 = vector.load %arg21[%c0_96, %c0_97] : memref<24x40xbf16, #tpu.memory_space<vmem>>, vector<24x40xbf16>
      tpu.vector_store %arg21[%c0_96, %c0_97], %143 {strides = array<i32>} : memref<24x40xbf16, #tpu.memory_space<vmem>>, vector<24x40xbf16>,
    } else {
    }
    %c0 = arith.constant 0 : index
    %c0_1 = arith.constant 0 : index
    %3 = vector.load %arg20[%c0, %c0_1] : memref<40x24xbf16, #tpu.memory_space<vmem>>, vector<40x24xbf16>
    %c0_2 = arith.constant 0 : index
    %c0_3 = arith.constant 0 : index
    %4 = vector.load %arg19[%c0_2, %c0_3] : memref<24x32xf32, #tpu.memory_space<vmem>>, vector<24x32xf32>
    %5 = arith.truncf %4 : vector<24x32xf32> to vector<24x32xbf16>
    %cst = arith.constant dense<0.000000e+00> : vector<40x32xf32>
    %6 = tpu.matmul %3, %5, %cst {dimension_numbers = #tpu.dot_dimension_numbers<[1], [0], [0], [1], [0, 0, 1, 1], [], []>} : vector<40x24xbf16>, vector<24x32xbf16>, vector<40x32xf32> -> vector<40x32xf32>
    %c0_4 = arith.constant 0 : index
    %c0_5 = arith.constant 0 : index
    %7 = vector.load %arg22[%c0_4, %c0_5] : memref<40x32xf32, #tpu.memory_space<vmem>>, vector<40x32xf32>
    tpu.vector_store %arg22[%c0_4, %c0_5], %6 {strides = array<i32>} : memref<40x32xf32, #tpu.memory_space<vmem>>, vector<40x32xf32>,
    %c0_6 = arith.constant 0 : index
    %c0_7 = arith.constant 0 : index
    %8 = vector.load %arg3[%c0_6, %c0_7] : memref<64x64xbf16, #tpu.memory_space<vmem>>, vector<64x64xbf16>
    %c0_8 = arith.constant 0 : index
    %c0_9 = arith.constant 0 : index
    %9 = vector.load %arg4[%c0_8, %c0_9] : memref<1x64xf32, #tpu.memory_space<vmem>>, vector<1x64xf32>
    %c0_10 = arith.constant 0 : index
    %c0_11 = arith.constant 0 : index
    %10 = vector.load %arg5[%c0_10, %c0_11] : memref<64x64xbf16, #tpu.memory_space<vmem>>, vector<64x64xbf16>
    %c0_12 = arith.constant 0 : index
    %c0_13 = arith.constant 0 : index
    %11 = vector.load %arg6[%c0_12, %c0_13] : memref<1x64xf32, #tpu.memory_space<vmem>>, vector<1x64xf32>
    %c0_14 = arith.constant 0 : index
    %c0_15 = arith.constant 0 : index
    %12 = vector.load %arg22[%c0_14, %c0_15] : memref<40x32xf32, #tpu.memory_space<vmem>>, vector<8x32xf32>
    %c8 = arith.constant 8 : index
    %c0_16 = arith.constant 0 : index
    %13 = vector.load %arg22[%c8, %c0_16] : memref<40x32xf32, #tpu.memory_space<vmem>>, vector<8x32xf32>
    %14 = tpu.concatenate %12, %13 in 1 : vector<8x32xf32>, vector<8x32xf32> -> vector<8x64xf32>
    %15 = arith.truncf %14 : vector<8x64xf32> to vector<8x64xbf16>
    %cst_17 = arith.constant dense<0.000000e+00> : vector<8x64xf32>
    %16 = tpu.matmul %15, %8, %cst_17 {dimension_numbers = #tpu.dot_dimension_numbers<[1], [0], [0], [1], [0, 0, 1, 1], [], []>} : vector<8x64xbf16>, vector<64x64xbf16>, vector<8x64xf32> -> vector<8x64xf32>
    %17 = vector.broadcast %9 : vector<1x64xf32> to vector<8x64xf32>
    %18 = arith.addf %16, %17 : vector<8x64xf32>
    %19 = math.exp %18 : vector<8x64xf32>
    %cst_18 = arith.constant 2.000000e+00 : f32
    %20 = vector.broadcast %cst_18 : f32 to vector<8x64xf32>
    %21 = arith.addf %19, %20 : vector<8x64xf32>
    %22 = arith.mulf %19, %21 : vector<8x64xf32>
    %cst_19 = arith.constant 2.000000e+00 : f32
    %23 = vector.broadcast %cst_19 : f32 to vector<8x64xf32>
    %24 = arith.addf %22, %23 : vector<8x64xf32>
    %cst_20 = arith.constant 2.000000e+00 : f32
    %25 = vector.broadcast %cst_20 : f32 to vector<8x64xf32>
    %26 = arith.divf %25, %24 : vector<8x64xf32>
    %cst_21 = arith.constant 1.000000e+00 : f32
    %27 = vector.broadcast %cst_21 : f32 to vector<8x64xf32>
    %28 = arith.subf %27, %26 : vector<8x64xf32>
    %29 = arith.mulf %18, %28 : vector<8x64xf32>
    %30 = arith.truncf %29 : vector<8x64xf32> to vector<8x64xbf16>
    %cst_22 = arith.constant dense<0.000000e+00> : vector<8x64xf32>
    %31 = tpu.matmul %30, %10, %cst_22 {dimension_numbers = #tpu.dot_dimension_numbers<[1], [0], [0], [1], [0, 0, 1, 1], [], []>} : vector<8x64xbf16>, vector<64x64xbf16>, vector<8x64xf32> -> vector<8x64xf32>
    %32 = vector.broadcast %11 : vector<1x64xf32> to vector<8x64xf32>
    %33 = arith.addf %31, %32 : vector<8x64xf32>
    %34 = arith.addf %14, %33 : vector<8x64xf32>
    %35 = vector.extract_strided_slice %34 {offsets = [0, 0], sizes = [8, 32], strides = [1, 1]} : vector<8x64xf32> to vector<8x32xf32>
    %c0_23 = arith.constant 0 : index
    %c0_24 = arith.constant 0 : index
    %36 = vector.load %arg23[%c0_23, %c0_24] : memref<40x32xf32, #tpu.memory_space<vmem>>, vector<8x32xf32>
    tpu.vector_store %arg23[%c0_23, %c0_24], %35 {strides = array<i32>} : memref<40x32xf32, #tpu.memory_space<vmem>>, vector<8x32xf32>,
    %37 = vector.extract_strided_slice %34 {offsets = [0, 32], sizes = [8, 32], strides = [1, 1]} : vector<8x64xf32> to vector<8x32xf32>
    %c8_25 = arith.constant 8 : index
    %c0_26 = arith.constant 0 : index
    %38 = vector.load %arg23[%c8_25, %c0_26] : memref<40x32xf32, #tpu.memory_space<vmem>>, vector<8x32xf32>
    tpu.vector_store %arg23[%c8_25, %c0_26], %37 {strides = array<i32>} : memref<40x32xf32, #tpu.memory_space<vmem>>, vector<8x32xf32>,
    %c0_27 = arith.constant 0 : index
    %c0_28 = arith.constant 0 : index
    %39 = vector.load %arg7[%c0_27, %c0_28] : memref<32x32xbf16, #tpu.memory_space<vmem>>, vector<32x32xbf16>
    %c0_29 = arith.constant 0 : index
    %c0_30 = arith.constant 0 : index
    %40 = vector.load %arg8[%c0_29, %c0_30] : memref<1x32xf32, #tpu.memory_space<vmem>>, vector<1x32xf32>
    %c0_31 = arith.constant 0 : index
    %c0_32 = arith.constant 0 : index
    %41 = vector.load %arg9[%c0_31, %c0_32] : memref<32x32xbf16, #tpu.memory_space<vmem>>, vector<32x32xbf16>
    %c0_33 = arith.constant 0 : index
    %c0_34 = arith.constant 0 : index
    %42 = vector.load %arg10[%c0_33, %c0_34] : memref<1x32xf32, #tpu.memory_space<vmem>>, vector<1x32xf32>
    %c16 = arith.constant 16 : index
    %c0_35 = arith.constant 0 : index
    %43 = vector.load %arg22[%c16, %c0_35] : memref<40x32xf32, #tpu.memory_space<vmem>>, vector<8x32xf32>
    %44 = arith.truncf %43 : vector<8x32xf32> to vector<8x32xbf16>
    %cst_36 = arith.constant dense<0.000000e+00> : vector<8x32xf32>
    %45 = tpu.matmul %44, %39, %cst_36 {dimension_numbers = #tpu.dot_dimension_numbers<[1], [0], [0], [1], [0, 0, 1, 1], [], []>} : vector<8x32xbf16>, vector<32x32xbf16>, vector<8x32xf32> -> vector<8x32xf32>
    %46 = vector.broadcast %40 : vector<1x32xf32> to vector<8x32xf32>
    %47 = arith.addf %45, %46 : vector<8x32xf32>
    %48 = math.exp %47 : vector<8x32xf32>
    %cst_37 = arith.constant 2.000000e+00 : f32
    %49 = vector.broadcast %cst_37 : f32 to vector<8x32xf32>
    %50 = arith.addf %48, %49 : vector<8x32xf32>
    %51 = arith.mulf %48, %50 : vector<8x32xf32>
    %cst_38 = arith.constant 2.000000e+00 : f32
    %52 = vector.broadcast %cst_38 : f32 to vector<8x32xf32>
    %53 = arith.addf %51, %52 : vector<8x32xf32>
    %cst_39 = arith.constant 2.000000e+00 : f32
    %54 = vector.broadcast %cst_39 : f32 to vector<8x32xf32>
    %55 = arith.divf %54, %53 : vector<8x32xf32>
    %cst_40 = arith.constant 1.000000e+00 : f32
    %56 = vector.broadcast %cst_40 : f32 to vector<8x32xf32>
    %57 = arith.subf %56, %55 : vector<8x32xf32>
    %58 = arith.mulf %47, %57 : vector<8x32xf32>
    %59 = arith.truncf %58 : vector<8x32xf32> to vector<8x32xbf16>
    %cst_41 = arith.constant dense<0.000000e+00> : vector<8x32xf32>
    %60 = tpu.matmul %59, %41, %cst_41 {dimension_numbers = #tpu.dot_dimension_numbers<[1], [0], [0], [1], [0, 0, 1, 1], [], []>} : vector<8x32xbf16>, vector<32x32xbf16>, vector<8x32xf32> -> vector<8x32xf32>
    %61 = vector.broadcast %42 : vector<1x32xf32> to vector<8x32xf32>
    %62 = arith.addf %60, %61 : vector<8x32xf32>
    %63 = arith.addf %43, %62 : vector<8x32xf32>
    %c16_42 = arith.constant 16 : index
    %c0_43 = arith.constant 0 : index
    %64 = vector.load %arg23[%c16_42, %c0_43] : memref<40x32xf32, #tpu.memory_space<vmem>>, vector<8x32xf32>
    tpu.vector_store %arg23[%c16_42, %c0_43], %63 {strides = array<i32>} : memref<40x32xf32, #tpu.memory_space<vmem>>, vector<8x32xf32>,
    %c0_44 = arith.constant 0 : index
    %c0_45 = arith.constant 0 : index
    %65 = vector.load %arg11[%c0_44, %c0_45] : memref<64x64xbf16, #tpu.memory_space<vmem>>, vector<64x64xbf16>
    %c0_46 = arith.constant 0 : index
    %c0_47 = arith.constant 0 : index
    %66 = vector.load %arg12[%c0_46, %c0_47] : memref<1x64xf32, #tpu.memory_space<vmem>>, vector<1x64xf32>
    %c0_48 = arith.constant 0 : index
    %c0_49 = arith.constant 0 : index
    %67 = vector.load %arg13[%c0_48, %c0_49] : memref<64x64xbf16, #tpu.memory_space<vmem>>, vector<64x64xbf16>
    %c0_50 = arith.constant 0 : index
    %c0_51 = arith.constant 0 : index
    %68 = vector.load %arg14[%c0_50, %c0_51] : memref<1x64xf32, #tpu.memory_space<vmem>>, vector<1x64xf32>
    %c24 = arith.constant 24 : index
    %c0_52 = arith.constant 0 : index
    %69 = vector.load %arg22[%c24, %c0_52] : memref<40x32xf32, #tpu.memory_space<vmem>>, vector<8x32xf32>
    %c32 = arith.constant 32 : index
    %c0_53 = arith.constant 0 : index
    %70 = vector.load %arg22[%c32, %c0_53] : memref<40x32xf32, #tpu.memory_space<vmem>>, vector<8x32xf32>
    %71 = tpu.concatenate %69, %70 in 1 : vector<8x32xf32>, vector<8x32xf32> -> vector<8x64xf32>
    %72 = arith.truncf %71 : vector<8x64xf32> to vector<8x64xbf16>
    %cst_54 = arith.constant dense<0.000000e+00> : vector<8x64xf32>
    %73 = tpu.matmul %72, %65, %cst_54 {dimension_numbers = #tpu.dot_dimension_numbers<[1], [0], [0], [1], [0, 0, 1, 1], [], []>} : vector<8x64xbf16>, vector<64x64xbf16>, vector<8x64xf32> -> vector<8x64xf32>
    %74 = vector.broadcast %66 : vector<1x64xf32> to vector<8x64xf32>
    %75 = arith.addf %73, %74 : vector<8x64xf32>
    %76 = math.exp %75 : vector<8x64xf32>
    %cst_55 = arith.constant 2.000000e+00 : f32
    %77 = vector.broadcast %cst_55 : f32 to vector<8x64xf32>
    %78 = arith.addf %76, %77 : vector<8x64xf32>
    %79 = arith.mulf %76, %78 : vector<8x64xf32>
    %cst_56 = arith.constant 2.000000e+00 : f32
    %80 = vector.broadcast %cst_56 : f32 to vector<8x64xf32>
    %81 = arith.addf %79, %80 : vector<8x64xf32>
    %cst_57 = arith.constant 2.000000e+00 : f32
    %82 = vector.broadcast %cst_57 : f32 to vector<8x64xf32>
    %83 = arith.divf %82, %81 : vector<8x64xf32>
    %cst_58 = arith.constant 1.000000e+00 : f32
    %84 = vector.broadcast %cst_58 : f32 to vector<8x64xf32>
    %85 = arith.subf %84, %83 : vector<8x64xf32>
    %86 = arith.mulf %75, %85 : vector<8x64xf32>
    %87 = arith.truncf %86 : vector<8x64xf32> to vector<8x64xbf16>
    %cst_59 = arith.constant dense<0.000000e+00> : vector<8x64xf32>
    %88 = tpu.matmul %87, %67, %cst_59 {dimension_numbers = #tpu.dot_dimension_numbers<[1], [0], [0], [1], [0, 0, 1, 1], [], []>} : vector<8x64xbf16>, vector<64x64xbf16>, vector<8x64xf32> -> vector<8x64xf32>
    %89 = vector.broadcast %68 : vector<1x64xf32> to vector<8x64xf32>
    %90 = arith.addf %88, %89 : vector<8x64xf32>
    %91 = arith.addf %71, %90 : vector<8x64xf32>
    %92 = vector.extract_strided_slice %91 {offsets = [0, 0], sizes = [8, 32], strides = [1, 1]} : vector<8x64xf32> to vector<8x32xf32>
    %c24_60 = arith.constant 24 : index
    %c0_61 = arith.constant 0 : index
    %93 = vector.load %arg23[%c24_60, %c0_61] : memref<40x32xf32, #tpu.memory_space<vmem>>, vector<8x32xf32>
    tpu.vector_store %arg23[%c24_60, %c0_61], %92 {strides = array<i32>} : memref<40x32xf32, #tpu.memory_space<vmem>>, vector<8x32xf32>,
    %94 = vector.extract_strided_slice %91 {offsets = [0, 32], sizes = [8, 32], strides = [1, 1]} : vector<8x64xf32> to vector<8x32xf32>
    %c32_62 = arith.constant 32 : index
    %c0_63 = arith.constant 0 : index
    %95 = vector.load %arg23[%c32_62, %c0_63] : memref<40x32xf32, #tpu.memory_space<vmem>>, vector<8x32xf32>
    tpu.vector_store %arg23[%c32_62, %c0_63], %94 {strides = array<i32>} : memref<40x32xf32, #tpu.memory_space<vmem>>, vector<8x32xf32>,
    %c0_64 = arith.constant 0 : index
    %c0_65 = arith.constant 0 : index
    %96 = vector.load %arg21[%c0_64, %c0_65] : memref<24x40xbf16, #tpu.memory_space<vmem>>, vector<24x40xbf16>
    %c0_66 = arith.constant 0 : index
    %c0_67 = arith.constant 0 : index
    %97 = vector.load %arg23[%c0_66, %c0_67] : memref<40x32xf32, #tpu.memory_space<vmem>>, vector<40x32xf32>
    %98 = arith.truncf %97 : vector<40x32xf32> to vector<40x32xbf16>
    %cst_68 = arith.constant dense<0.000000e+00> : vector<24x32xf32>
    %99 = tpu.matmul %96, %98, %cst_68 {dimension_numbers = #tpu.dot_dimension_numbers<[1], [0], [0], [1], [0, 0, 1, 1], [], []>} : vector<24x40xbf16>, vector<40x32xbf16>, vector<24x32xf32> -> vector<24x32xf32>
    %c0_69 = arith.constant 0 : index
    %c0_70 = arith.constant 0 : index
    %100 = vector.load %arg19[%c0_69, %c0_70] : memref<24x32xf32, #tpu.memory_space<vmem>>, vector<24x32xf32>
    %101 = tpu.concatenate %99, %100 in 1 : vector<24x32xf32>, vector<24x32xf32> -> vector<24x64xf32>
    %102 = arith.truncf %101 : vector<24x64xf32> to vector<24x64xbf16>
    %c0_71 = arith.constant 0 : index
    %c0_72 = arith.constant 0 : index
    %103 = vector.load %arg15[%c0_71, %c0_72] : memref<64x64xbf16, #tpu.memory_space<vmem>>, vector<64x64xbf16>
    %cst_73 = arith.constant dense<0.000000e+00> : vector<24x64xf32>
    %104 = tpu.matmul %102, %103, %cst_73 {dimension_numbers = #tpu.dot_dimension_numbers<[1], [0], [0], [1], [0, 0, 1, 1], [], []>} : vector<24x64xbf16>, vector<64x64xbf16>, vector<24x64xf32> -> vector<24x64xf32>
    %c0_74 = arith.constant 0 : index
    %c0_75 = arith.constant 0 : index
    %105 = vector.load %arg16[%c0_74, %c0_75] : memref<1x64xf32, #tpu.memory_space<vmem>>, vector<1x64xf32>
    %106 = vector.broadcast %105 : vector<1x64xf32> to vector<24x64xf32>
    %107 = arith.addf %104, %106 : vector<24x64xf32>
    %108 = math.exp %107 : vector<24x64xf32>
    %cst_76 = arith.constant 2.000000e+00 : f32
    %109 = vector.broadcast %cst_76 : f32 to vector<24x64xf32>
    %110 = arith.addf %108, %109 : vector<24x64xf32>
    %111 = arith.mulf %108, %110 : vector<24x64xf32>
    %cst_77 = arith.constant 2.000000e+00 : f32
    %112 = vector.broadcast %cst_77 : f32 to vector<24x64xf32>
    %113 = arith.addf %111, %112 : vector<24x64xf32>
    %cst_78 = arith.constant 2.000000e+00 : f32
    %114 = vector.broadcast %cst_78 : f32 to vector<24x64xf32>
    %115 = arith.divf %114, %113 : vector<24x64xf32>
    %cst_79 = arith.constant 1.000000e+00 : f32
    %116 = vector.broadcast %cst_79 : f32 to vector<24x64xf32>
    %117 = arith.subf %116, %115 : vector<24x64xf32>
    %118 = arith.mulf %107, %117 : vector<24x64xf32>
    %119 = arith.truncf %118 : vector<24x64xf32> to vector<24x64xbf16>
    %c0_80 = arith.constant 0 : index
    %c0_81 = arith.constant 0 : index
    %120 = vector.load %arg17[%c0_80, %c0_81] : memref<64x32xbf16, #tpu.memory_space<vmem>>, vector<64x32xbf16>
    %cst_82 = arith.constant dense<0.000000e+00> : vector<24x32xf32>
    %121 = tpu.matmul %119, %120, %cst_82 {dimension_numbers = #tpu.dot_dimension_numbers<[1], [0], [0], [1], [0, 0, 1, 1], [], []>} : vector<24x64xbf16>, vector<64x32xbf16>, vector<24x32xf32> -> vector<24x32xf32>
    %c0_83 = arith.constant 0 : index
    %c0_84 = arith.constant 0 : index
    %122 = vector.load %arg18[%c0_83, %c0_84] : memref<1x32xf32, #tpu.memory_space<vmem>>, vector<1x32xf32>
    %123 = vector.broadcast %122 : vector<1x32xf32> to vector<24x32xf32>
    %124 = arith.addf %121, %123 : vector<24x32xf32>
    %125 = arith.addf %100, %124 : vector<24x32xf32>
    %c0_85 = arith.constant 0 : index
    %c0_86 = arith.constant 0 : index
    %126 = vector.load %arg19[%c0_85, %c0_86] : memref<24x32xf32, #tpu.memory_space<vmem>>, vector<24x32xf32>
    tpu.vector_store %arg19[%c0_85, %c0_86], %125 {strides = array<i32>} : memref<24x32xf32, #tpu.memory_space<vmem>>, vector<24x32xf32>,
    return
  }
  func.func @transform_0(%arg0: i32) -> (i32, i32) {
    %c0_i32 = arith.constant 0 : i32
    %c0_i32_0 = arith.constant 0 : i32
    %c0_i32_1 = arith.constant 0 : i32
    return %c0_i32, %c0_i32_0 : i32, i32
  }
  func.func @transform_1(%arg0: i32) -> (i32, i32) {
    %c0_i32 = arith.constant 0 : i32
    %c0_i32_0 = arith.constant 0 : i32
    %c0_i32_1 = arith.constant 0 : i32
    return %c0_i32, %c0_i32_0 : i32, i32
  }
  func.func @transform_2(%arg0: i32) -> (i32, i32) {
    %c0_i32 = arith.constant 0 : i32
    %c0_i32_0 = arith.constant 0 : i32
    %c0_i32_1 = arith.constant 0 : i32
    return %c0_i32, %c0_i32_0 : i32, i32
  }
  func.func @transform_3(%arg0: i32) -> (i32, i32) {
    %c0_i32 = arith.constant 0 : i32
    %c0_i32_0 = arith.constant 0 : i32
    %c0_i32_1 = arith.constant 0 : i32
    return %c0_i32, %c0_i32_0 : i32, i32
  }
  func.func @transform_4(%arg0: i32) -> (i32, i32) {
    %c0_i32 = arith.constant 0 : i32
    %c0_i32_0 = arith.constant 0 : i32
    %c0_i32_1 = arith.constant 0 : i32
    return %c0_i32, %c0_i32_0 : i32, i32
  }
  func.func @transform_5(%arg0: i32) -> (i32, i32) {
    %c0_i32 = arith.constant 0 : i32
    %c0_i32_0 = arith.constant 0 : i32
    %c0_i32_1 = arith.constant 0 : i32
    return %c0_i32, %c0_i32_0 : i32, i32
  }
  func.func @transform_6(%arg0: i32) -> (i32, i32) {
    %c0_i32 = arith.constant 0 : i32
    %c0_i32_0 = arith.constant 0 : i32
    %c0_i32_1 = arith.constant 0 : i32
    return %c0_i32, %c0_i32_0 : i32, i32
  }
  func.func @transform_7(%arg0: i32) -> (i32, i32) {
    %c0_i32 = arith.constant 0 : i32
    %c0_i32_0 = arith.constant 0 : i32
    %c0_i32_1 = arith.constant 0 : i32
    return %c0_i32, %c0_i32_0 : i32, i32
  }
  func.func @transform_8(%arg0: i32) -> (i32, i32) {
    %c0_i32 = arith.constant 0 : i32
    %c0_i32_0 = arith.constant 0 : i32
    %c0_i32_1 = arith.constant 0 : i32
    return %c0_i32, %c0_i32_0 : i32, i32
  }
  func.func @transform_9(%arg0: i32) -> (i32, i32) {
    %c0_i32 = arith.constant 0 : i32
    %c0_i32_0 = arith.constant 0 : i32
    %c0_i32_1 = arith.constant 0 : i32
    return %c0_i32, %c0_i32_0 : i32, i32
  }
  func.func @transform_10(%arg0: i32) -> (i32, i32) {
    %c0_i32 = arith.constant 0 : i32
    %c0_i32_0 = arith.constant 0 : i32
    %c0_i32_1 = arith.constant 0 : i32
    return %c0_i32, %c0_i32_0 : i32, i32
  }
  func.func @transform_11(%arg0: i32) -> (i32, i32) {
    %c0_i32 = arith.constant 0 : i32
    %c0_i32_0 = arith.constant 0 : i32
    %c0_i32_1 = arith.constant 0 : i32
    return %c0_i32, %c0_i32_0 : i32, i32
  }
  func.func @transform_12(%arg0: i32) -> (i32, i32) {
    %c0_i32 = arith.constant 0 : i32
    %c0_i32_0 = arith.constant 0 : i32
    %c0_i32_1 = arith.constant 0 : i32
    return %c0_i32, %c0_i32_0 : i32, i32
  }
  func.func @transform_13(%arg0: i32) -> (i32, i32) {
    %c0_i32 = arith.constant 0 : i32
    %c0_i32_0 = arith.constant 0 : i32
    %c0_i32_1 = arith.constant 0 : i32
    return %c0_i32, %c0_i32_0 : i32, i32
  }
  func.func @transform_14(%arg0: i32) -> (i32, i32) {
    %c0_i32 = arith.constant 0 : i32
    %c0_i32_0 = arith.constant 0 : i32
    %c0_i32_1 = arith.constant 0 : i32
    return %c0_i32, %c0_i32_0 : i32, i32
  }
  func.func @transform_15(%arg0: i32) -> (i32, i32) {
    %c0_i32 = arith.constant 0 : i32
    %c0_i32_0 = arith.constant 0 : i32
    %c0_i32_1 = arith.constant 0 : i32
    return %c0_i32, %c0_i32_0 : i32, i32
  }
  func.func @transform_16(%arg0: i32) -> (i32, i32) {
    %c0_i32 = arith.constant 0 : i32
    %c0_i32_0 = arith.constant 0 : i32
    %c0_i32_1 = arith.constant 0 : i32
    return %c0_i32, %c0_i32_0 : i32, i32
  }
  func.func @transform_17(%arg0: i32) -> (i32, i32) {
    %c0_i32 = arith.constant 0 : i32
    %c0_i32_0 = arith.constant 0 : i32
    %c0_i32_1 = arith.constant 0 : i32
    return %c0_i32, %c0_i32_0 : i32, i32
  }
  func.func @transform_18(%arg0: i32) -> (i32, i32) {
    %c0_i32 = arith.constant 0 : i32
    %c0_i32_0 = arith.constant 0 : i32
    %c0_i32_1 = arith.constant 0 : i32
    return %c0_i32, %c0_i32_0 : i32, i32
  }
}

</mosaic_0001>

<bundles_post_ra>
// kernel: tpu_custom_call.1
= control target key start
LH: loop header
LB: loop body
LE: loop exit
PB: predicated region body
PF: predicated region fallthrough
CT: control target
= control target key end

     0   :  { %s3288_s0 = inlined_call_operand.vmem [shape: s32[40,1], index: 0, kind: input, shape index: {}]   ;;  %s3289_s1 = inlined_call_operand.hbm [shape: s32[1,40], index: 1, kind: input, shape index: {}]   ;;  %s3290_s2 = inlined_call_operand.vmem [shape: bf16[64,64], index: 2, kind: input, shape index: {}]   ;;  %s3291_s3 = inlined_call_operand.vmem [shape: f32[1,64], index: 3, kind: input, shape index: {}]   ;;  %s3292_s4 = inlined_call_operand.vmem [shape: bf16[64,64], index: 4, kind: input, shape index: {}]   ;;  %s3293_s5 = inlined_call_operand.hbm [shape: f32[1,64], index: 5, kind: input, shape index: {}]   ;;  %s3294_s6 = inlined_call_operand.hbm [shape: bf16[32,32], index: 6, kind: input, shape index: {}]   ;;  %s3295_s7 = inlined_call_operand.hbm [shape: f32[1,32], index: 7, kind: input, shape index: {}]   ;;  %s3296_s8 = inlined_call_operand.hbm [shape: bf16[32,32], index: 8, kind: input, shape index: {}]   ;;  %s3297_s9 = inlined_call_operand.hbm [shape: f32[1,32], index: 9, kind: input, shape index: {}]   ;;  %s3298_s10 = inlined_call_operand.vmem [shape: bf16[64,64], index: 10, kind: input, shape index: {}]   ;;  %s3299_s11 = inlined_call_operand.hbm [shape: f32[1,64], index: 11, kind: input, shape index: {}]   ;;  %s3300_s12 = inlined_call_operand.vmem [shape: bf16[64,64], index: 12, kind: input, shape index: {}]   ;;  %s3301_s13 = inlined_call_operand.hbm [shape: f32[1,64], index: 13, kind: input, shape index: {}]   ;;  %s3302_s14 = inlined_call_operand.hbm [shape: bf16[64,64], index: 14, kind: input, shape index: {}]   ;;  %s3303_s15 = inlined_call_operand.hbm [shape: f32[1,64], index: 15, kind: input, shape index: {}]   ;;  %s3304_s16 = inlined_call_operand.vmem [shape: bf16[64,32], index: 16, kind: input, shape index: {}]   ;;  %s3305_s17 = inlined_call_operand.vmem [shape: f32[1,32], index: 17, kind: input, shape index: {}]   ;;  %s3306_s18 = inlined_call_operand.hbm [shape: f32[24,32], index: 18, kind: output, shape index: {}]  }
   0x1   :  { %3314 = sst [smem:[#allocation32_spill]] %s3288_s0 }
   0x2   :  { %3315 = sst [smem:[#allocation33_spill]] %s3289_s1 }
   0x3   :  { %3316 = sst [smem:[#allocation34_spill]] %s3290_s2 }
   0x4   :  { %3317 = sst [smem:[#allocation35_spill]] %s3293_s5 }
   0x5   :  { %3318 = sst [smem:[#allocation36_spill]] %s3295_s7 }
   0x6   :  { %3319 = sst [smem:[#allocation37_spill]] %s3297_s9 }
   0x7   :  { %3320 = sst [smem:[#allocation38_spill]] %s3301_s13 }
   0x8   :  { %3321 = sst [smem:[#allocation39_spill]] %s3305_s17 }
   0x9   :  { %3322 = sst [smem:[#allocation40_spill]] %s3306_s18 }
   0xa   :  { %23 = vsyncpa [#allocation7], 0 }
   0xb   :  { %24 = vsyncpa [#allocation10], 0 }
   0xc   :  { %25 = vsyncpa [#allocation13], 0 }
   0xd   :  { %26 = vsyncpa [#allocation16], 0 }
   0xe   :  { %27 = vsyncpa [#allocation19], 0 }
   0xf   :  { %28 = vsyncpa [#allocation22], 0 }
  0x10   :  { %29 = vsyncpa [#allocation8], 0  ;;  %s2782_s27 = smov 0  }
  0x11 LB: > { %3323 = sst [smem:[#allocation31_spill]] %s2664_s27  ;;  %s2666_s28 = smov [#allocation9]   ;;  %s2664_s27 = sphi %s2782_s27, %s35_s27  }
  0x12   : > { %s475_s29 = sshll.u32 %s2666_s28, 4  ;;  %s2788_s30 = sadd.s32 4294967295, %s2664_s27   ;;  %s2794_s29 = int_to_ptr.vmem [resolvable:$true] %s475_s29 }
  0x13   : > { %p1859_p0 = scmp.ge.s32.totalorder %s2664_s27, 1  ;;  %p439_p1 = scmp.lt.s32.totalorder %s2664_s27, 3 }
  0x14   : > { %p3312_p3 = scmp.eq.s32.totalorder %s2788_s30, 0  ;;  %s2667_s19 = smov [#allocation12]  }
  0x15   : > { %p2796_p4 = pnand %p1859_p0, %p439_p1  ;;  %s499_s1 = sshll.u32 %s2667_s19, 4  ;;  %s2802_s1 = int_to_ptr.vmem [resolvable:$true] %s499_s1 }
  0x16   : > { %s2668_s20 = smov [#allocation15]   ;;  %s2669_s2 = smov [#allocation18]  }
  0x17   : > { %s3324_s0 = scalar_select %p2796_p4, 1, 0 }
  0x18   : > { %p2178_p5 = pneg %p2796_p4  ;;  %s523_s21 = sshll.u32 %s2668_s20, 4  ;;  %s2810_s21 = int_to_ptr.vmem [resolvable:$true] %s523_s21 }
  0x19   : > { %s551_s23 = sshll.u32 %s2669_s2, 4  ;;  %s3326_s5 = sld [smem:[#allocation35_spill]]  ;;  %s2812_s23 = int_to_ptr.vmem [resolvable:$true] %s551_s23 }
  0x1a   : > { %p2806_p6 = pnand %p3312_p3, %p2178_p5 }
  0x1c   : > { %p2822_p8 = pneg %p2806_p6 }
  0x1f   : > { %s2324_s26 = scalar_lea.hbm %s3326_s5, 16 }
  0x20   : > { %p2325_p7 = scmp.ne.s32.totalorder %s3326_s5, %s2324_s26  ;;  %p2331_p11 = scmp.lt.u32.totalorder %s2324_s26, %s3326_s5 }
  0x22   : > { %p2327_p9 = pnand %p2822_p8, %p2325_p7 }
  0x24   : > { %p2328_p10 = pneg %p2327_p9 }
  0x26   : > { %p2333_p12 = pnand %p2331_p11, %p2328_p10 }
  0x28   : > { %2336 = shalt.err (!%p2333_p12)
}
  0x29   : > { %s2337_s24 = scalar_lea.vmem %s2794_s29, 16  ;;  %s2344_s25 = scalar_lea.vmem %s2794_s29, 32 }
  0x2a   : > { %p2338_p13 = scmp.ne.s32.totalorder %s2794_s29, %s2337_s24  ;;  %p2345_p5 = scmp.lt.s32.totalorder %s2794_s29, %s2794_s29 }
  0x2b   : > { %p2346_p7 = scmp.lt.s32.totalorder %s2344_s25, %s2337_s24 }
  0x2c   : > { %p2340_p0 = pnand %p2338_p13, %p2822_p8 }
  0x2d   : > { %p2347_p9 = por %p2346_p7, %p2345_p5 }
  0x2e   : > { %p2341_p1 = pneg %p2340_p0 }
  0x30   : > { %p2348_p2 = pnand %p2347_p9, %p2341_p1 }
  0x32   : > { %2351 = shalt.err (!%p2348_p2)
}
  0x33   : > { %2184 = dma.hbm_to_vmem [thread:$0]  (!%p2806_p6), %s3326_s5, 16, %s2794_s29, [#allocation10]  }
  0x34   : > { %s3328_s7 = sld [smem:[#allocation36_spill]] }
  0x3a   : > { %s2352_s2 = scalar_lea.hbm %s3328_s7, 16 }
  0x3b   : > { %p2353_p10 = scmp.ne.s32.totalorder %s3328_s7, %s2352_s2  ;;  %p2359_p2 = scmp.lt.u32.totalorder %s2352_s2, %s3328_s7 }
  0x3d   : > { %p2355_p11 = pnand %p2353_p10, %p2822_p8 }
  0x3f   : > { %p2356_p12 = pneg %p2355_p11 }
  0x41   : > { %p2361_p13 = pnand %p2359_p2, %p2356_p12 }
  0x43   : > { %2364 = shalt.err (!%p2361_p13)
}
  0x44   : > { %s2365_s29 = scalar_lea.vmem %s2802_s1, 16  ;;  %s2372_s17 = scalar_lea.vmem %s2802_s1, 32 }
  0x45   : > { %p2366_p0 = scmp.ne.s32.totalorder %s2802_s1, %s2365_s29  ;;  %p2373_p7 = scmp.lt.s32.totalorder %s2802_s1, %s2802_s1 }
  0x46   : > { %p2374_p9 = scmp.lt.s32.totalorder %s2372_s17, %s2365_s29 }
  0x47   : > { %p2368_p1 = pnand %p2366_p0, %p2822_p8 }
  0x48   : > { %p2375_p10 = por %p2374_p9, %p2373_p7 }
  0x49   : > { %p2369_p5 = pneg %p2368_p1 }
  0x4b   : > { %p2376_p11 = pnand %p2375_p10, %p2369_p5 }
  0x4d   : > { %2379 = shalt.err (!%p2376_p11)
}
  0x4e   : > { %2190 = dma.hbm_to_vmem [thread:$0]  (!%p2806_p6), %s3328_s7, 16, %s2802_s1, [#allocation13]  }
  0x4f   : > { %s3329_s9 = sld [smem:[#allocation37_spill]] }
  0x55   : > { %s2380_s19 = scalar_lea.hbm %s3329_s9, 16 }
  0x56   : > { %p2381_p12 = scmp.ne.s32.totalorder %s3329_s9, %s2380_s19  ;;  %p2387_p0 = scmp.lt.u32.totalorder %s2380_s19, %s3329_s9 }
  0x58   : > { %p2383_p2 = pnand %p2381_p12, %p2822_p8 }
  0x5a   : > { %p2384_p13 = pneg %p2383_p2 }
  0x5c   : > { %p2389_p1 = pnand %p2387_p0, %p2384_p13 }
  0x5e   : > { %2392 = shalt.err (!%p2389_p1)
}
  0x5f   : > { %s2393_s1 = scalar_lea.vmem %s2810_s21, 16  ;;  %s2400_s17 = scalar_lea.vmem %s2810_s21, 32 }
  0x60   : > { %p2394_p5 = scmp.ne.s32.totalorder %s2810_s21, %s2393_s1  ;;  %p2401_p10 = scmp.lt.s32.totalorder %s2810_s21, %s2810_s21 }
  0x61   : > { %p2402_p11 = scmp.lt.s32.totalorder %s2400_s17, %s2393_s1 }
  0x62   : > { %p2396_p7 = pnand %p2394_p5, %p2822_p8 }
  0x63   : > { %p2403_p12 = por %p2402_p11, %p2401_p10 }
  0x64   : > { %p2397_p9 = pneg %p2396_p7 }
  0x66   : > { %p2404_p2 = pnand %p2403_p12, %p2397_p9 }
  0x68   : > { %2407 = shalt.err (!%p2404_p2)
}
  0x69   : > { %2196 = dma.hbm_to_vmem [thread:$0]  (!%p2806_p6), %s3329_s9, 16, %s2810_s21, [#allocation16]  }
  0x6a   : > { %s3330_s13 = sld [smem:[#allocation38_spill]] }
  0x70   : > { %s2408_s19 = scalar_lea.hbm %s3330_s13, 16 }
  0x71   : > { %p2409_p13 = scmp.ne.s32.totalorder %s3330_s13, %s2408_s19  ;;  %p2415_p5 = scmp.lt.u32.totalorder %s2408_s19, %s3330_s13 }
  0x73   : > { %p2411_p0 = pnand %p2409_p13, %p2822_p8 }
  0x75   : > { %p2412_p1 = pneg %p2411_p0 }
  0x77   : > { %p2417_p7 = pnand %p2415_p5, %p2412_p1 }
  0x79   : > { %2420 = shalt.err (!%p2417_p7)
}
  0x7a   : > { %s2421_s21 = scalar_lea.vmem %s2812_s23, 16  ;;  %s2428_s1 = scalar_lea.vmem %s2812_s23, 32 }
  0x7b   : > { %p2422_p9 = scmp.ne.s32.totalorder %s2812_s23, %s2421_s21  ;;  %p2429_p12 = scmp.lt.s32.totalorder %s2812_s23, %s2812_s23 }
  0x7c   : > { %p2430_p2 = scmp.lt.s32.totalorder %s2428_s1, %s2421_s21 }
  0x7d   : > { %p2424_p10 = pnand %p2422_p9, %p2822_p8 }
  0x7e   : > { %p2431_p13 = por %p2430_p2, %p2429_p12 }
  0x7f   : > { %p2425_p11 = pneg %p2424_p10 }
  0x81   : > { %p2432_p0 = pnand %p2431_p13, %p2425_p11 }
  0x83   : > { %2435 = shalt.err (!%p2432_p0)
}
  0x84   : > { %2202 = dma.hbm_to_vmem [thread:$0]  (!%p2806_p6), %s3330_s13, 16, %s2812_s23, [#allocation19]  }
  0x85   : > { %s2670_s27 = smov [#allocation6]   ;;  %s2671_s28 = smov [#allocation11]  }
  0x86   : > { %s455_s26 = sshll.u32 %s2670_s27, 4  ;;  %s485_s19 = sshll.u32 %s2671_s28, 4  ;;  %s456_s26 = int_to_ptr.vmem [resolvable:$true] %s455_s26  ;;  %s486_s19 = int_to_ptr.vmem [resolvable:$true] %s485_s19 }
  0x87   : > { %s3331_s25 = sld [smem:[#allocation33_spill]] }
  0x8d   : > { %s2436_s29 = scalar_lea.hbm %s3331_s25, 16 }
  0x8e   : > { %p2437_p1 = scmp.ne.s32.totalorder %s3331_s25, %s2436_s29  ;;  %p2443_p9 = scmp.lt.u32.totalorder %s2436_s29, %s3331_s25 }
  0x90   : > { %p2439_p5 = pnand %p2437_p1, %p2822_p8 }
  0x92   : > { %p2440_p7 = pneg %p2439_p5 }
  0x94   : > { %p2445_p10 = pnand %p2443_p9, %p2440_p7 }
  0x96   : > { %2448 = shalt.err (!%p2445_p10)
}
  0x97   : > { %s2449_s23 = scalar_lea.vmem %s456_s26, 16  ;;  %s2456_s18 = scalar_lea.vmem %s456_s26, 32 }
  0x98   : > { %p2450_p11 = scmp.ne.s32.totalorder %s456_s26, %s2449_s23  ;;  %p2457_p13 = scmp.lt.s32.totalorder %s456_s26, %s456_s26 }
  0x99   : > { %p2458_p0 = scmp.lt.s32.totalorder %s2456_s18, %s2449_s23 }
  0x9a   : > { %p2452_p12 = pnand %p2450_p11, %p2822_p8 }
  0x9b   : > { %p2459_p3 = por %p2458_p0, %p2457_p13 }
  0x9c   : > { %p2453_p2 = pneg %p2452_p12 }
  0x9e   : > { %p2460_p4 = pnand %p2459_p3, %p2453_p2 }
  0xa0   : > { %2463 = shalt.err (!%p2460_p4)
}
  0xa1   : > { %2181 = dma.hbm_to_vmem [thread:$0]  (!%p2806_p6), %s3331_s25, 16, %s456_s26, [#allocation7]  }
  0xa2   : > { %s2464_s24 = scalar_lea.hbm %s3294_s6, 256 }
  0xa3   : > { %p2465_p1 = scmp.ne.s32.totalorder %s3294_s6, %s2464_s24  ;;  %p2471_p4 = scmp.lt.u32.totalorder %s2464_s24, %s3294_s6 }
  0xa5   : > { %p2467_p5 = pnand %p2465_p1, %p2822_p8 }
  0xa7   : > { %p2468_p3 = pneg %p2467_p5 }
  0xa9   : > { %p2473_p7 = pnand %p2471_p4, %p2468_p3 }
  0xab   : > { %2476 = shalt.err (!%p2473_p7)
}
  0xac   : > { %s2477_s23 = scalar_lea.vmem %s486_s19, 256  ;;  %p2485_p12 = scmp.lt.s32.totalorder %s486_s19, %s486_s19 }
  0xad   : > { %p2478_p9 = scmp.ne.s32.totalorder %s486_s19, %s2477_s23  ;;  %p2486_p2 = scmp.lt.s32.totalorder %s2477_s23, %s2477_s23 }
  0xaf   : > { %p2480_p10 = pnand %p2478_p9, %p2822_p8  ;;  %p2487_p13 = por %p2486_p2, %p2485_p12 }
  0xb1   : > { %p2481_p11 = pneg %p2480_p10 }
  0xb3   : > { %p2488_p0 = pnand %p2487_p13, %p2481_p11 }
  0xb5   : > { %2491 = shalt.err (!%p2488_p0)
}
  0xb6   : > { %s2672_s26 = smov 64   ;;  %s2673_s18 = smov 4  }
  0xb7   : > { %2187 = dma.hbm_to_vmem [thread:$0]  (!%p2806_p6), %s3294_s6, 256, %s486_s19, [#allocation10], %s2672_s26, %s2672_s26, %s2673_s18  }
  0xb8   : > { %s2674_s5 = smov [#allocation14]   ;;  %s2675_s24 = smov [#allocation17]  }
  0xb9   : > { %s509_s2 = sshll.u32 %s2674_s5, 4  ;;  %s537_s29 = sshll.u32 %s2675_s24, 4  ;;  %s510_s2 = int_to_ptr.vmem [resolvable:$true] %s509_s2  ;;  %s538_s29 = int_to_ptr.vmem [resolvable:$true] %s537_s29 }
  0xba   : > { %s2492_s17 = scalar_lea.hbm %s3296_s8, 256 }
  0xbb   : > { %p2493_p1 = scmp.ne.s32.totalorder %s3296_s8, %s2492_s17  ;;  %p2499_p4 = scmp.lt.u32.totalorder %s2492_s17, %s3296_s8 }
  0xbd   : > { %p2495_p5 = pnand %p2493_p1, %p2822_p8 }
  0xbf   : > { %p2496_p3 = pneg %p2495_p5 }
  0xc1   : > { %p2501_p7 = pnand %p2499_p4, %p2496_p3 }
  0xc3   : > { %2504 = shalt.err (!%p2501_p7)
}
  0xc4   : > { %s2505_s19 = scalar_lea.vmem %s510_s2, 256  ;;  %p2513_p12 = scmp.lt.s32.totalorder %s510_s2, %s510_s2 }
  0xc5   : > { %p2506_p9 = scmp.ne.s32.totalorder %s510_s2, %s2505_s19  ;;  %p2514_p2 = scmp.lt.s32.totalorder %s2505_s19, %s2505_s19 }
  0xc7   : > { %p2508_p10 = pnand %p2506_p9, %p2822_p8  ;;  %p2515_p13 = por %p2514_p2, %p2513_p12 }
  0xc9   : > { %p2509_p11 = pneg %p2508_p10 }
  0xcb   : > { %p2516_p0 = pnand %p2515_p13, %p2509_p11 }
  0xcd   : > { %2519 = shalt.err (!%p2516_p0)
}
  0xce   : > { %2193 = dma.hbm_to_vmem [thread:$0]  (!%p2806_p6), %s3296_s8, 256, %s510_s2, [#allocation13], %s2672_s26, %s2672_s26, %s2673_s18  }
  0xcf   : > { %s2520_s28 = scalar_lea.hbm %s3299_s11, 16 }
  0xd0   : > { %p2521_p1 = scmp.ne.s32.totalorder %s3299_s11, %s2520_s28  ;;  %p2527_p4 = scmp.lt.u32.totalorder %s2520_s28, %s3299_s11 }
  0xd2   : > { %p2523_p5 = pnand %p2521_p1, %p2822_p8 }
  0xd4   : > { %p2524_p3 = pneg %p2523_p5 }
  0xd6   : > { %p2529_p7 = pnand %p2527_p4, %p2524_p3 }
  0xd8   : > { %2532 = shalt.err (!%p2529_p7)
}
  0xd9   : > { %s2533_s17 = scalar_lea.vmem %s538_s29, 16  ;;  %s2540_s2 = scalar_lea.vmem %s538_s29, 32 }
  0xda   : > { %p2534_p9 = scmp.ne.s32.totalorder %s538_s29, %s2533_s17  ;;  %p2541_p12 = scmp.lt.s32.totalorder %s538_s29, %s538_s29 }
  0xdb   : > { %p2542_p2 = scmp.lt.s32.totalorder %s2540_s2, %s2533_s17 }
  0xdc   : > { %p2536_p10 = pnand %p2534_p9, %p2822_p8 }
  0xdd   : > { %p2543_p13 = por %p2542_p2, %p2541_p12 }
  0xde   : > { %p2537_p11 = pneg %p2536_p10 }
  0xe0   : > { %p2544_p0 = pnand %p2543_p13, %p2537_p11 }
  0xe2   : > { %2547 = shalt.err (!%p2544_p0)
}
  0xe3   : > { %2199 = dma.hbm_to_vmem [thread:$0]  (!%p2806_p6), %s3299_s11, 16, %s538_s29, [#allocation16]  }
  0xe4   : > { %s2676_s7 = smov [#allocation20]   ;;  %s2677_s13 = smov [#allocation21]  }
  0xe5   : > { %s561_s9 = sshll.u32 %s2676_s7, 4  ;;  %s575_s27 = sshll.u32 %s2677_s13, 4  ;;  %s562_s9 = int_to_ptr.vmem [resolvable:$true] %s561_s9  ;;  %s576_s27 = int_to_ptr.vmem [resolvable:$true] %s575_s27 }
  0xe6   : > { %s2548_s24 = scalar_lea.hbm %s3302_s14, 512 }
  0xe7   : > { %p2549_p1 = scmp.ne.s32.totalorder %s3302_s14, %s2548_s24  ;;  %p2555_p4 = scmp.lt.u32.totalorder %s2548_s24, %s3302_s14 }
  0xe9   : > { %p2551_p5 = pnand %p2549_p1, %p2822_p8 }
  0xeb   : > { %p2552_p3 = pneg %p2551_p5 }
  0xed   : > { %p2557_p7 = pnand %p2555_p4, %p2552_p3 }
  0xef   : > { %2560 = shalt.err (!%p2557_p7)
}
  0xf0   : > { %s2561_s29 = scalar_lea.vmem %s562_s9, 512  ;;  %p2569_p12 = scmp.lt.s32.totalorder %s562_s9, %s562_s9 }
  0xf1   : > { %p2562_p9 = scmp.ne.s32.totalorder %s562_s9, %s2561_s29  ;;  %p2570_p2 = scmp.lt.s32.totalorder %s2561_s29, %s2561_s29 }
  0xf3   : > { %p2564_p10 = pnand %p2562_p9, %p2822_p8  ;;  %p2571_p13 = por %p2570_p2, %p2569_p12 }
  0xf5   : > { %p2565_p11 = pneg %p2564_p10 }
  0xf7   : > { %p2572_p0 = pnand %p2571_p13, %p2565_p11 }
  0xf9   : > { %2575 = shalt.err (!%p2572_p0)
}
  0xfa   : > { %2205 = dma.hbm_to_vmem [thread:$0]  (!%p2806_p6), %s3302_s14, 512, %s562_s9, [#allocation19], %s2672_s26, %s2672_s26, %s2673_s18  }
  0xfb   : > { %s2576_s28 = scalar_lea.hbm %s3303_s15, 16 }
  0xfc   : > { %p2577_p1 = scmp.ne.s32.totalorder %s3303_s15, %s2576_s28  ;;  %p2583_p4 = scmp.lt.u32.totalorder %s2576_s28, %s3303_s15 }
  0xfe   : > { %p2579_p5 = pnand %p2577_p1, %p2822_p8 }
 0x100   : > { %p2580_p3 = pneg %p2579_p5 }
 0x102   : > { %p2585_p7 = pnand %p2583_p4, %p2580_p3 }
 0x104   : > { %2588 = shalt.err (!%p2585_p7)
}
 0x105   : > { %s2589_s17 = scalar_lea.vmem %s576_s27, 16  ;;  %s2596_s26 = scalar_lea.vmem %s576_s27, 32 }
 0x106   : > { %p2590_p9 = scmp.ne.s32.totalorder %s576_s27, %s2589_s17  ;;  %p2597_p12 = scmp.lt.s32.totalorder %s576_s27, %s576_s27 }
 0x107   : > { %p2598_p2 = scmp.lt.s32.totalorder %s2596_s26, %s2589_s17 }
 0x108   : > { %p2592_p10 = pnand %p2590_p9, %p2822_p8 }
 0x109   : > { %p2599_p13 = por %p2598_p2, %p2597_p12 }
 0x10a   : > { %p2593_p11 = pneg %p2592_p10 }
 0x10c   : > { %p2600_p0 = pnand %p2599_p13, %p2593_p11 }
 0x10e   : > { %2603 = shalt.err (!%p2600_p0)
}
 0x10f   : > { %2208 = dma.hbm_to_vmem [thread:$0]  (!%p2806_p6), %s3303_s15, 16, %s576_s27, [#allocation22]  }
 0x110   : > { %p3332_p1 = scmp.ne.s32.totalorder %s3324_s0, 0 }
 0x111   : > { %p3333_p5 = scmp.eq.s32.totalorder (!%p3332_p1), %s2788_s30, 0 }
 0x112   : > { %594 = sbr.rel (%p3332_p1) target bundleno = 2377 (0x949), region = 92 }
 0x119   : > { %2635 = dma.done.wait (%p3333_p5), [#allocation7], 16   ;;  %p3334_p8 = pmov %p3333_p5 }
 0x11a   : > { %p3335_p3 = pmov %p3333_p5 }
 0x11b   : > { %2637 = vsyncadd (%p3334_p8), [#allocation7], 4294967280 }
 0x11c   : > { %2639 = dma.done.wait (%p3335_p3), [#allocation10], 272   ;;  %p3336_p4 = pmov %p3335_p3 }
 0x11d   : > { %p3337_p7 = pmov %p3335_p3 }
 0x11e   : > { %2641 = vsyncadd (%p3336_p4), [#allocation10], 4294967024 }
 0x11f   : > { %2643 = dma.done.wait (%p3337_p7), [#allocation13], 272   ;;  %p3338_p6 = pmov %p3335_p3 }
 0x120   : > { %p3339_p9 = pmov %p3335_p3 }
 0x121   : > { %2645 = vsyncadd (%p3338_p6), [#allocation13], 4294967024 }
 0x122   : > { %2647 = dma.done.wait (%p3339_p9), [#allocation16], 32   ;;  %p3340_p10 = pmov %p3335_p3 }
 0x123   : > { %p3341_p11 = pmov %p3335_p3 }
 0x124   : > { %2649 = vsyncadd (%p3340_p10), [#allocation16], 4294967264 }
 0x125   : > { %2651 = dma.done.wait (%p3341_p11), [#allocation19], 528   ;;  %p3342_p12 = pmov %p3335_p3 }
 0x126   : > { %p3343_p2 = pmov %p3335_p3 }
 0x127   : > { %2653 = vsyncadd (%p3342_p12), [#allocation19], 4294966768 }
 0x128   : > { %2655 = dma.done.wait (%p3343_p2), [#allocation22], 16   ;;  %p3344_p13 = pmov %p3343_p2 }
 0x129   : > { %p3345_p0 = scmp.ne.s32.totalorder %s2788_s30, 0 }
 0x12a   : > { %2657 = vsyncadd (%p3344_p13), [#allocation22], 4294967280  ;;  %s3346_s20 = sld [smem:[#allocation32_spill]] (!%p3345_p0)  ;;  %v2678_v2 = vmov (!%p3345_p0), 0   ;;  %vm679_vm0 = vcmask (!%p3345_p0), 261120   ;;  %v2679_v3 = vmov (!%p3345_p0), 0.0   ;;  %v683_v6 = vlaneseq (!%p3345_p0) }
 0x12b   : > { %678 = sbr.rel (%p3345_p0) target bundleno = 446 (0x1be), region = 136  ;;  %2261 = vset.pattern.permute.xlu1 (!%p3345_p0), %v2678_v2  ;;  %2260 = vset.pattern.permute.xlu0 (!%p3345_p0), %v2678_v2  ;;  %680 = vst.msk [vmem:[#allocation23] sm:$0xff] (!%p3345_p0), %vm679_vm0, %v2679_v3  ;;  %681 = vst.msk [vmem:[#allocation23 + $0x8] sm:$0xff] (!%p3345_p0), %vm679_vm0, %v2679_v3  ;;  %v1892_v7 = vld [vmem:[#allocation6] ss:$0 sm:$0xff] (!%p3345_p0)  ;;  %vm778_vm2 = vcmask (!%p3345_p0), 322560  }
 0x12c   : > { %682 = vst.msk [vmem:[#allocation23 + $0x10] sm:$0xff] (!%p3345_p0), %vm679_vm0, %v2679_v3  ;;  %v748_v8 = vshrl.u32 (!%p3345_p0), %v683_v6, 7  ;;  %v684_v18 = vand.u32 (!%p3345_p0), 127, %v683_v6  ;;  %vm741_vm7 = vcmask (!%p3345_p0), 191488  }
 0x12e   : > { %v749_v10 = vadd.s32 (!%p3345_p0), 8, %v748_v8  ;;  %v750_v11 = vadd.s32 (!%p3345_p0), 16, %v748_v8  ;;  %vm756_vm1 = vcmp.eq.s32.totalorder (!%p3345_p0), %v1892_v7, %v748_v8 }
 0x12f   : > { %v1893_v12 = vsel (!%p3345_p0), %vm756_vm1, 1.0, %v2679_v3 }
 0x130   : > { %v687_v0 = vld [vmem:[%s3346_s20 + $0x10] sm:$0xff] (!%p3345_p0)  ;;  %v685_v1 = vld [vmem:[%s3346_s20] sm:$0xff] (!%p3345_p0)  ;;  %v688_v4 = vld [vmem:[%s3346_s20 + $0x18] sm:$0xff] (!%p3345_p0)  ;;  %vm757_vm3 = vcmp.eq.s32.totalorder (!%p3345_p0), %v1892_v7, %v749_v10  ;;  %vm758_vm4 = vcmp.eq.s32.totalorder (!%p3345_p0), %v1892_v7, %v750_v11  ;;  %v1964_v13 = vpack.c.bf16 (!%p3345_p0), %v1893_v12, %v1893_v12 }
 0x131   : > { %697 = vperm.xlu1 (!%p3345_p0), %2261, %v687_v0   ;;  %691 = vperm.xlu0 (!%p3345_p0), %2260, %v685_v1   ;;  %v686_v5 = vld [vmem:[%s3346_s20 + $0x8] sm:$0xff] (!%p3345_p0)  ;;  %v689_v9 = vld [vmem:[%s3346_s20 + $0x20] sm:$0xff] (!%p3345_p0)  ;;  %v1894_v14 = vsel (!%p3345_p0), %vm757_vm3, 1.0, %v2679_v3  ;;  %v1895_v15 = vsel (!%p3345_p0), %vm758_vm4, 1.0, %v2679_v3 }
 0x132   : > { %v1965_v16 = vpack.c.bf16 %v1894_v14, %v1894_v14  ;;  %v1966_v17 = vpack.c.bf16 %v1895_v15, %v1895_v15  ;;  %779 = vst.msk [vmem:[#allocation3] sm:$0xf] %vm778_vm2, %v1964_v13 }
 0x134   : > { %780 = vst.msk [vmem:[#allocation3 + $0x4] sm:$0xf] %vm778_vm2, %v1965_v16  ;;  %781 = vst.msk [vmem:[#allocation3 + $0x8] sm:$0xf] %vm778_vm2, %v1966_v17 }
 0x135   : > { %700 = vperm.xlu1 %2261, %v688_v4   ;;  %694 = vperm.xlu0 %2260, %v686_v5  }
 0x139   : > { %703 = vperm.xlu0 %2260, %v689_v9  }
 0x1b0   : > { %v698_v19 = vpop.permute.xlu1 %697  ;;  %v692_v20 = vpop.permute.xlu0 %691 }
 0x1b1   : > { %vm707_vm5 = vcmp.eq.s32.totalorder %v698_v19, %v684_v18  ;;  %vm705_vm6 = vcmp.eq.s32.totalorder %v692_v20, %v684_v18 }
 0x1b2   : > { %v1884_v21 = vsel %vm707_vm5, 1.0, %v2679_v3  ;;  %v1882_v22 = vsel %vm705_vm6, 1.0, %v2679_v3 }
 0x1b3   : > { %v1961_v23 = vpack.c.bf16 %v1884_v21, %v1884_v21  ;;  %v1959_v24 = vpack.c.bf16 %v1882_v22, %v1882_v22 }
 0x1b4   : > { %v701_v25 = vpop.permute.xlu1 %700  ;;  %v695_v26 = vpop.permute.xlu0 %694 }
 0x1b5   : > { %744 = vst.msk [vmem:[#allocation2 + $0x8] sm:$0xf] %vm741_vm7, %v1961_v23  ;;  %742 = vst.msk [vmem:[#allocation2] sm:$0xf] %vm741_vm7, %v1959_v24  ;;  %vm708_vm8 = vcmp.eq.s32.totalorder %v701_v25, %v684_v18  ;;  %vm706_vm9 = vcmp.eq.s32.totalorder %v695_v26, %v684_v18 }
 0x1b6   : > { %v1885_v27 = vsel %vm708_vm8, 1.0, %v2679_v3  ;;  %v1883_v28 = vsel %vm706_vm9, 1.0, %v2679_v3 }
 0x1b7   : > { %v1962_v29 = vpack.c.bf16 %v1885_v27, %v1885_v27  ;;  %v1960_v30 = vpack.c.bf16 %v1883_v28, %v1883_v28 }
 0x1b8   : > { %v704_v31 = vpop.permute.xlu0 %703 }
 0x1b9   : > { %745 = vst.msk [vmem:[#allocation2 + $0xc] sm:$0xf] %vm741_vm7, %v1962_v29  ;;  %743 = vst.msk [vmem:[#allocation2 + $0x4] sm:$0xf] %vm741_vm7, %v1960_v30  ;;  %vm709_vm10 = vcmp.eq.s32.totalorder %v704_v31, %v684_v18 }
 0x1ba   : > { %v1886_v32 = vsel %vm709_vm10, 1.0, %v2679_v3 }
 0x1bb   : > { %v1963_v33 = vpack.c.bf16 %v1886_v32, %v1886_v32 }
 0x1bd   : > { %746 = vst.msk [vmem:[#allocation2 + $0x10] sm:$0xf] %vm741_vm7, %v1963_v33 }
 0x1be PF: > { %v3081_v34 = vld [vmem:[#allocation23] sm:$0xff]  ;;  %v3083_v35 = vld [vmem:[#allocation23 + $0x8] sm:$0xff]  ;;  %vm815_vm11 = vcmask 1043456   ;;  %v2680_v37 = vmov 0.0   ;;  %vm2681_vm12 = vmmov 0   ;;  %vm805_vm13 = vcmask 195584  }
 0x1bf   : > { %v3085_v36 = vld [vmem:[#allocation23 + $0x10] sm:$0xff]  ;;  %2015 = vmatprep.subr.bf16.mxu0 %v2680_v37  ;;  %v790_v38 = vpack.c.bf16 %v3083_v35, %v3081_v34  ;;  %2019 = vmatprep.mubr.msk.bf16.mxu0 %vm2681_vm12, %v2680_v37  ;;  %s3347_s21 = sld [smem:[#allocation34_spill]]  ;;  %vm875_vm14 = vcmask 261120   ;;  %s2682_s22 = smov 32   ;;  %vm937_vm15 = vcmask 523264   ;;  %v2275_v1 = vld [vmem:[#allocation11 + $0x8] sm:$0xff]  }
 0x1c0   : > { %v791_v39 = vpack.c.bf16 %v3085_v36, %v3085_v36  ;;  %2129 = vmatprep.subr.bf16.mxu1 %v2680_v37  ;;  %2027 = vmatprep.mubr.msk.bf16.mxu1 %vm2681_vm12, %v2680_v37  ;;  %v2267_v41 = vld [vmem:[#allocation2] sm:$0xff]   ;;  %v2268_v42 = vld [vmem:[#allocation2 + $0x8] sm:$0xff]   ;;  %v2274_v63 = vld [vmem:[#allocation11] sm:$0xff]   ;;  %s2683_s1 = smov 96   ;;  %vm1425_vm0 = vcmask 326656   ;;  %s3348_s19 = sld [smem:[#allocation39_spill]] }
 0x1c1   : > { %2016 = vmatpush3.bf16.msra.mxu0 %v790_v38  ;;  %2131 = vmatpush3.bf16.msra.mxu1 %v790_v38  ;;  %v2276_v4 = vld [vmem:[%s3292_s4] sm:$0xff]   ;;  %v2277_v5 = vld [vmem:[%s3292_s4 + $0x8] sm:$0xff]   ;;  %v2278_v8 = vld [vmem:[%s3292_s4 + $0x10] sm:$0xff]   ;;  %s2684_s7 = smov [#allocation23]   ;;  %p2229_p1 = scmp.eq.s32.totalorder %s2788_s30, 1 }
 0x1c2   : > { %v817_v40 = vsel %vm815_vm11, %v791_v39, 0  ;;  %2017 = vmatprep.subr.bf16.mxu0 %v2680_v37  ;;  %2130 = vmatprep.subr.bf16.mxu1 %v2680_v37  ;;  %v2279_v9 = vld [vmem:[%s3292_s4 + $0x18] sm:$0xff]   ;;  %v2281_v10 = vld [vmem:[#allocation14] sm:$0xff]   ;;  %v2283_v11 = vld [vmem:[#allocation14 + $0x8] sm:$0xff]   ;;  %s1730_s13 = sshll.u32 %s2684_s7, 4  ;;  %s1731_s13 = int_to_ptr.vmem [resolvable:$true] %s1730_s13 }
 0x1c3   : > { %v1905_v12 = vld [vmem:[%s3291_s3] ss:$0 sm:$0xff]  ;;  %v1917_v19 = vld [vmem:[#allocation12] ss:$0 sm:$0xff]  ;;  %s2604_s28 = scalar_lea.vmem %s1731_s13, 384  ;;  %p2611_p4 = scmp.lt.s32.totalorder %s1731_s13, %s1731_s13 }
 0x1c4   : > { %v2269_v43 = vld [vmem:[#allocation2 + $0x10] ss:$0 sps:$4 sm:$0xff]   ;;  %p2605_p5 = scmp.ne.s32.totalorder %s1731_s13, %s2604_s28  ;;  %p2612_p7 = scmp.lt.s32.totalorder %s2604_s28, %s2604_s28 }
 0x1c5   : > { %2018 = vmatpush3.bf16.msra.mxu0 %v817_v40  ;;  %2132 = vmatpush3.bf16.msra.mxu1 %v817_v40  ;;  %v2270_v44 = vld [vmem:[%s3347_s21] sm:$0xff]   ;;  %v2271_v45 = vld [vmem:[%s3347_s21 + $0x8] sm:$0xff]   ;;  %v2272_v46 = vld [vmem:[%s3347_s21 + $0x10] sm:$0xff]  }
 0x1c6   : > { %2031 = vmatprep.subr.bf16.mxu1 %v2680_v37  ;;  %2043 = vmatprep.subr.bf16.mxu0 %v2680_v37  ;;  %v2273_v47 = vld [vmem:[%s3347_s21 + $0x18] sm:$0xff]   ;;  %p2606_p8 = pnand %p2605_p5, %p2229_p1  ;;  %p2613_p6 = por %p2612_p7, %p2611_p4 }
 0x1c8   : > { %2020 = vmatmul.mubr.msk.bf16.vlgmr.msra.gmra.mrb[0].mxu0 %vm805_vm13, %v2267_v41  ;;  %2028 = vmatmul.mubr.msk.bf16.vlgmr.msra.gmra.mrb[0].mxu1 %vm805_vm13, %v2269_v43  ;;  %p2607_p3 = pneg %p2606_p8 }
 0x1c9   : > { %2023 = vmatprep.mubr.msk.bf16.mxu0 %vm2681_vm12, %v2680_v37  ;;  %2032 = vmatpush3.bf16.msra.mxu1 %v2270_v44 }
 0x1ca   : > { %2039 = vmatprep.mubr.msk.bf16.mxu1 %vm2681_vm12, %v2680_v37  ;;  %2033 = vmatprep.subr.bf16.mxu1 %v2680_v37  ;;  %p2614_p9 = pnand %p2613_p6, %p2607_p3 }
 0x1cb   : > { %2044 = vmatpush3.bf16.msra.mxu0 %v2276_v4 }
 0x1cc   : > { %2045 = vmatprep.subr.bf16.mxu0 %v2680_v37 }
 0x1cd   : > { %2034 = vmatpush3.bf16.msra.mxu1 %v2271_v45 }
 0x1ce   : > { %2035 = vmatprep.subr.bf16.mxu1 %v2680_v37 }
 0x1cf   : > { %2046 = vmatpush3.bf16.msra.mxu0 %v2277_v5  ;;  %v1921_v5 = vld [vmem:[#allocation15] ss:$0 sm:$0xff] }
 0x1d0   : > { %2024 = vmatmul.mubr.msk.bf16.gmra.mrb[4].mxu0 %vm805_vm13, %v2268_v42  ;;  %2047 = vmatprep.subr.bf16.mxu0 %v2680_v37  ;;  %v2280_v42 = vld [vmem:[%s3298_s10] sm:$0xff]  }
 0x1d1   : > { %2051 = vmatprep.mubr.msk.bf16.mxu0 %vm2681_vm12, %v2680_v37  ;;  %2036 = vmatpush3.bf16.msra.mxu1 %v2272_v46  ;;  %v2282_v46 = vld [vmem:[%s3298_s10 + $0x8] sm:$0xff]  }
 0x1d2   : > { %2037 = vmatprep.subr.bf16.mxu1 %v2680_v37 }
 0x1d3   : > { %2048 = vmatpush3.bf16.msra.mxu0 %v2278_v8 }
 0x1d4   : > { %2049 = vmatprep.subr.bf16.mxu0 %v2680_v37 }
 0x1d5   : > { %2038 = vmatpush3.bf16.msra.mxu1 %v2273_v47 }
 0x1d6   : > { %2055 = vmatprep.subr.bf16.mxu1 %v2680_v37 }
 0x1d7   : > { %2050 = vmatpush3.bf16.msra.mxu0 %v2279_v9 }
 0x1d8   : > { %2071 = vmatprep.subr.bf16.mxu0 %v2680_v37 }
 0x29b   : > { %v853_v48 = vpop.f32.mrb[0].mxu0  ;;  %v869_v55 = vpop.f32.mrb[0].mxu1 }
 0x29c   : > { %876 = vst.msk [vmem:[#allocation4] sm:$0xff] %vm875_vm14, %v853_v48  ;;  %v2021_v49 = vpop.f32.mrb[1].mxu0  ;;  %880 = vst.msk [vmem:[#allocation4 + $0x20] sm:$0xff] %vm875_vm14, %v869_v55  ;;  %v2029_v56 = vpop.f32.mrb[1].mxu1 }
 0x29d   : > { %v856_v50 = vpop.f32.mrb[2].mxu0  ;;  %v872_v57 = vpop.f32.mrb[2].mxu1  ;;  %v2284_v49 = vld [vmem:[%s3298_s10 + $0x10] sm:$0xff]   ;;  %v2286_v56 = vld [vmem:[%s3300_s12] sm:$0xff]  }
 0x29e   : > { %877 = vst.msk [vmem:[#allocation4 + $0x8] sm:$0xff] %vm875_vm14, %v856_v50  ;;  %v2022_v51 = vpop.f32.mrb[3].mxu0  ;;  %v2030_v58 = vpop.f32.mrb[3].mxu1  ;;  %v2287_v57 = vld [vmem:[%s3300_s12 + $0x8] sm:$0xff]  }
 0x29f   : > { %v2288_v58 = vld [vmem:[%s3300_s12 + $0x10] sm:$0xff]  }
 0x2a3   : > { %v861_v52 = vpop.f32.mrb[4].mxu0  ;;  %v1236_v59 = vld [vmem:[#allocation4 + $0x20] sm:$0xff] }
 0x2a4   : > { %878 = vst.msk [vmem:[#allocation4 + $0x10] sm:$0xff] %vm875_vm14, %v861_v52  ;;  %v2025_v53 = vpop.f32.mrb[5].mxu0  ;;  %v899_v60 = vld [vmem:[#allocation4] sm:$0xff] }
 0x2a5   : > { %v900_v54 = vld [vmem:[#allocation4 + $0x8] sm:$0xff]  ;;  %v864_v6 = vpop.f32.mrb[6].mxu0  ;;  %v2285_v53 = vld [vmem:[%s3298_s10 + $0x18] sm:$0xff]  }
 0x2a6   : > { %902 = vrot.lane.b32.xlu0 %v900_v54, %s2682_s22  ;;  %879 = vst.msk [vmem:[#allocation4 + $0x18] sm:$0xff] %vm875_vm14, %v864_v6  ;;  %v2026_v7 = vpop.f32.mrb[7].mxu0 }
 0x2aa   : > { %1238 = vrot.lane.b32.xlu0 %v1236_v59, %s2682_s22  ;;  %v2289_v59 = vld [vmem:[%s3300_s12 + $0x18] sm:$0xff]  }
 0x2ab   : > { %v3141_v2 = vld [vmem:[#allocation4 + $0x10] sm:$0xff] }
 0x2ac   : > { %v1082_v3 = vpack.c.bf16 %v3141_v2, %v3141_v2 }
 0x2ad   : > { %v1235_v52 = vld [vmem:[#allocation4 + $0x18] sm:$0xff] }
 0x318   : > { %v903_v61 = vpop.permute.xlu0 %902 }
 0x319   : > { %v3134_v62 = vsel %vm875_vm14, %v899_v60, %v903_v61  ;;  %v1911_v60 = vld [vmem:[#allocation9] ss:$0 sm:$0xff] }
 0x31a   : > { %v906_v0 = vpack.c.bf16 %v3134_v62, %v3134_v62 }
 0x31c   : > { %2040 = vmatmul.mubr.msk.bf16.vlgmr.msra.gmra.mrb[4].mxu1 %vm937_vm15, %v906_v0  ;;  %v1239_v51 = vpop.permute.xlu0 %1238 }
 0x31d   : > { %2056 = vmatpush3.bf16.msra.mxu1 %v2274_v63  ;;  %2059 = vmatprep.mubr.msk.bf16.mxu1 %vm2681_vm12, %v2680_v37  ;;  %v3194_v54 = vsel %vm875_vm14, %v1235_v52, %v1239_v51  ;;  %v2291_v52 = vld [vmem:[#allocation3 + $0x8] ss:$0 sps:$4 sm:$0xff]  }
 0x31e   : > { %2057 = vmatprep.subr.bf16.mxu1 %v2680_v37  ;;  %v1242_v55 = vpack.c.bf16 %v3194_v54, %v3194_v54 }
 0x321   : > { %2058 = vmatpush3.bf16.msra.mxu1 %v2275_v1 }
 0x322   : > { %2063 = vmatprep.subr.bf16.mxu1 %v2680_v37 }
 0x324   : > { %2060 = vmatmul.mubr.msk.bf16.vlgmr.msra.gmra.mrb[8].mxu1 %vm875_vm14, %v1082_v3 }
 0x325   : > { %2067 = vmatprep.mubr.msk.bf16.mxu1 %vm2681_vm12, %v2680_v37  ;;  %2064 = vmatpush3.bf16.msra.mxu1 %v2281_v10 }
 0x326   : > { %2065 = vmatprep.subr.bf16.mxu1 %v2680_v37 }
 0x329   : > { %2066 = vmatpush3.bf16.msra.mxu1 %v2283_v11  ;;  %v1925_v11 = vld [vmem:[#allocation17] ss:$0 sm:$0xff] }
 0x32a   : > { %2083 = vmatprep.subr.bf16.mxu1 %v2680_v37 }
 0x3ef   : > { %v975_v13 = vpop.f32.mrb[4].mxu1 }
 0x3f0   : > { %v976_v14 = vadd.f32 %v1905_v12, %v975_v13  ;;  %v2041_v15 = vpop.f32.mrb[5].mxu1 }
 0x3f1   : > { %v978_v16 = vpop.f32.mrb[6].mxu1 }
 0x3f2   : > { %v981_v17 = vmul.f32 1.442695, %v976_v14  ;;  %v2042_v18 = vpop.f32.mrb[7].mxu1 }
 0x3f4   : > { %2300 = vpow2.f32 %v981_v17 }
 0x3f7   : > { %v1138_v20 = vpop.f32.mrb[8].mxu1 }
 0x3f8   : > { %v1139_v21 = vadd.f32 %v1917_v19, %v1138_v20  ;;  %v2061_v22 = vpop.f32.mrb[9].mxu1 }
 0x3f9   : > { %v1141_v23 = vpop.f32.mrb[10].mxu1 }
 0x3fa   : > { %v1144_v24 = vmul.f32 1.442695, %v1139_v21  ;;  %v2062_v25 = vpop.f32.mrb[11].mxu1 }
 0x3fc   : > { %2302 = vpow2.f32 %v1144_v24 }
 0x3fe   : > { %v2301_v26 = vpop.eup %2300 }
 0x3ff   : > { %v983_v27 = vadd.f32 2.0, %v2301_v26 }
 0x401   : > { %v984_v28 = vmul.f32 %v2301_v26, %v983_v27 }
 0x403   : > { %v985_v29 = vadd.f32 2.0, %v984_v28 }
 0x405   : > { %2304 = vrcp.f32 %v985_v29  ;;  %v1931_v29 = vld [vmem:[#allocation18] ss:$0 sm:$0xff] }
 0x406   : > { %v2303_v30 = vpop.eup %2302 }
 0x407   : > { %v1146_v31 = vadd.f32 2.0, %v2303_v30 }
 0x409   : > { %v1147_v32 = vmul.f32 %v2303_v30, %v1146_v31 }
 0x40b   : > { %v1148_v33 = vadd.f32 2.0, %v1147_v32 }
 0x40d   : > { %2306 = vrcp.f32 %v1148_v33 }
 0x40f   : > { %v2305_v38 = vpop.eup %2304 }
 0x410   : > { %v987_v39 = vmul.f32 2.0, %v2305_v38 }
 0x412   : > { %v988_v40 = vsub.f32 1.0, %v987_v39 }
 0x414   : > { %v989_v41 = vmul.f32 %v988_v40, %v976_v14  ;;  %v2290_v40 = vld [vmem:[#allocation3] sm:$0xff]  }
 0x416   : > { %v990_v43 = vpack.c.bf16 %v989_v41, %v989_v41  ;;  %v2262_v41 = vpack.i.bf16 %v3083_v35, %v3081_v34 }
 0x417   : > { %v2307_v44 = vpop.eup %2306 }
 0x418   : > { %v1150_v45 = vmul.f32 2.0, %v2307_v44  ;;  %2052 = vmatmul.mubr.msk.bf16.vlgmr.msra.gmra.mrb[8].mxu0 %vm937_vm15, %v990_v43  ;;  %v2293_v43 = vld [vmem:[#allocation20 + $0x8] sm:$0xff]   ;;  %2263 = vrot.lane.b32.xlu0 %v2262_v41, %s2682_s22  ;;  %v2294_v44 = vld [vmem:[#allocation20 + $0x10] sm:$0xff]  }
 0x419   : > { %2072 = vmatpush3.bf16.msra.mxu0 %v2280_v42  ;;  %2079 = vmatprep.mubr.msk.bf16.mxu0 %vm2681_vm12, %v2680_v37  ;;  %v2292_v42 = vld [vmem:[#allocation20] sm:$0xff]  }
 0x41a   : > { %v1151_v47 = vsub.f32 1.0, %v1150_v45  ;;  %2073 = vmatprep.subr.bf16.mxu0 %v2680_v37 }
 0x41c   : > { %v1152_v48 = vmul.f32 %v1151_v47, %v1139_v21 }
 0x41d   : > { %2074 = vmatpush3.bf16.msra.mxu0 %v2282_v46 }
 0x41e   : > { %v1153_v50 = vpack.c.bf16 %v1152_v48, %v1152_v48  ;;  %2075 = vmatprep.subr.bf16.mxu0 %v2680_v37 }
 0x420   : > { %2068 = vmatmul.mubr.msk.bf16.vlgmr.msra.gmra.mrb[12].mxu1 %vm875_vm14, %v1153_v50 }
 0x421   : > { %2076 = vmatpush3.bf16.msra.mxu0 %v2284_v49  ;;  %2091 = vmatprep.mubr.msk.bf16.mxu1 %vm2681_vm12, %v2680_v37 }
 0x422   : > { %2077 = vmatprep.subr.bf16.mxu0 %v2680_v37  ;;  %2084 = vmatpush3.bf16.msra.mxu1 %v2286_v56 }
 0x423   : > { %2085 = vmatprep.subr.bf16.mxu1 %v2680_v37 }
 0x425   : > { %2078 = vmatpush3.bf16.msra.mxu0 %v2285_v53  ;;  %v2295_v53 = vld [vmem:[#allocation20 + $0x18] sm:$0xff]  }
 0x426   : > { %2086 = vmatpush3.bf16.msra.mxu1 %v2287_v57 }
 0x427   : > { %2087 = vmatprep.subr.bf16.mxu1 %v2680_v37 }
 0x428   : > { %2080 = vmatmul.mubr.msk.bf16.vlgmr.msra.gmra.mrb[12].mxu0 %vm937_vm15, %v1242_v55 }
 0x429   : > { %2101 = vmatprep.mubr.msk.bf16.mxu0 %vm1425_vm0, %v2290_v40 }
 0x42a   : > { %2088 = vmatpush3.bf16.msra.mxu1 %v2288_v58 }
 0x42b   : > { %2089 = vmatprep.subr.bf16.mxu1 %v2680_v37 }
 0x42e   : > { %2090 = vmatpush3.bf16.msra.mxu1 %v2289_v59 }
 0x42f   : > { %2105 = vmatprep.subr.bf16.mxu1 %v2292_v42 }
 0x4eb   : > { %v1058_v61 = vpop.f32.mrb[8].mxu0 }
 0x4ec   : > { %v1059_v63 = vadd.f32 %v1911_v60, %v1058_v61  ;;  %v2053_v0 = vpop.f32.mrb[9].mxu0 }
 0x4ed   : > { %v1061_v1 = vpop.f32.mrb[10].mxu0 }
 0x4ee   : > { %v2054_v3 = vpop.f32.mrb[11].mxu0  ;;  %v1064_v4 = vadd.f32 %v1059_v63, %v3134_v62 }
 0x4f0   : > { %1067 = vrot.lane.b32.xlu1 %v1064_v4, %s2683_s1  ;;  %1065 = vst.msk [vmem:[#allocation5] sm:$0xff] %vm875_vm14, %v1064_v4 }
 0x4f3   : > { %v1209_v37 = vpop.f32.mrb[12].mxu1 }
 0x4f4   : > { %v1210_v6 = vadd.f32 %v1921_v5, %v1209_v37  ;;  %v2069_v7 = vpop.f32.mrb[13].mxu1  ;;  %v2296_v5 = vld [vmem:[%s3304_s16] sm:$0xff]   ;;  %v2297_v37 = vld [vmem:[%s3304_s16 + $0x8] sm:$0xff]  }
 0x4f5   : > { %v1212_v8 = vpop.f32.mrb[14].mxu1  ;;  %v2299_v7 = vld [vmem:[%s3304_s16 + $0x18] sm:$0xff]  }
 0x4f6   : > { %v1215_v9 = vadd.f32 %v1210_v6, %v3141_v2  ;;  %v2070_v10 = vpop.f32.mrb[15].mxu1  ;;  %v2298_v6 = vld [vmem:[%s3304_s16 + $0x10] sm:$0xff]   ;;  %v1941_v8 = vld [vmem:[#allocation21] ss:$0 sm:$0xff] }
 0x4f7   : > { %v1409_v26 = vld [vmem:[#allocation5] sm:$0xff] }
 0x4f8   : > { %1216 = vst.msk [vmem:[#allocation5 + $0x10] sm:$0xff] %vm875_vm14, %v1215_v9 }
 0x4fb   : > { %v1310_v12 = vpop.f32.mrb[12].mxu0 }
 0x4fc   : > { %v1311_v13 = vadd.f32 %v1925_v11, %v1310_v12  ;;  %v2081_v14 = vpop.f32.mrb[13].mxu0 }
 0x4fd   : > { %v1313_v62 = vpop.f32.mrb[14].mxu0 }
 0x4fe   : > { %v1316_v15 = vmul.f32 1.442695, %v1311_v13  ;;  %v2082_v16 = vpop.f32.mrb[15].mxu0 }
 0x4ff   : > { %v1411_v45 = vld [vmem:[#allocation5 + $0x10] sm:$0xff] }
 0x500   : > { %2308 = vpow2.f32 %v1316_v15 }
 0x50a   : > { %v2309_v17 = vpop.eup %2308 }
 0x50b   : > { %v1318_v18 = vadd.f32 2.0, %v2309_v17 }
 0x50d   : > { %v1319_v19 = vmul.f32 %v2309_v17, %v1318_v18 }
 0x50f   : > { %v1320_v20 = vadd.f32 2.0, %v1319_v19 }
 0x511   : > { %2310 = vrcp.f32 %v1320_v20 }
 0x51b   : > { %v2311_v21 = vpop.eup %2310 }
 0x51c   : > { %v1322_v22 = vmul.f32 2.0, %v2311_v21 }
 0x51e   : > { %v1323_v23 = vsub.f32 1.0, %v1322_v22 }
 0x520   : > { %v1324_v2 = vmul.f32 %v1323_v23, %v1311_v13 }
 0x522   : > { %v1325_v24 = vpack.c.bf16 %v1324_v2, %v1324_v2 }
 0x524   : > { %2092 = vmatmul.mubr.msk.bf16.vlgmr.msra.gmra.mrb[16].mxu1 %vm937_vm15, %v1325_v24 }
 0x525   : > { %2106 = vmatpush3.bf16.msra.mxu1 %v2292_v42 }
 0x526   : > { %2107 = vmatprep.subr.bf16.mxu1 %v2293_v43 }
 0x529   : > { %2108 = vmatpush3.bf16.msra.mxu1 %v2293_v43 }
 0x52a   : > { %2109 = vmatprep.subr.bf16.mxu1 %v2294_v44 }
 0x52d   : > { %2110 = vmatpush3.bf16.msra.mxu1 %v2294_v44 }
 0x52e   : > { %2111 = vmatprep.subr.bf16.mxu1 %v2295_v53 }
 0x531   : > { %2112 = vmatpush3.bf16.msra.mxu1 %v2295_v53 }
 0x562   : > { %v1068_v25 = vpop.permute.xlu1 %1067 }
 0x563   : > { %1070 = vst.msk [vmem:[#allocation5 + $0x8] sm:$0xff] %vm875_vm14, %v1068_v25 }
 0x56a   : > { %v1410_v27 = vld [vmem:[#allocation5 + $0x8] sm:$0xff] }
 0x56b   : > { %v1414_v28 = vpack.c.bf16 %v1410_v27, %v1409_v26 }
 0x56d   : > { %2095 = vmatprep.subr.bf16.mxu0 %v1414_v28 }
 0x56e   : > { %2096 = vmatpush3.bf16.msra.mxu0 %v1414_v28 }
 0x5f7   : > { %v1393_v30 = vpop.f32.mrb[16].mxu1 }
 0x5f8   : > { %v1394_v31 = vadd.f32 %v1931_v29, %v1393_v30  ;;  %v2093_v32 = vpop.f32.mrb[17].mxu1 }
 0x5f9   : > { %v1396_v33 = vpop.f32.mrb[18].mxu1 }
 0x5fa   : > { %v1399_v38 = vadd.f32 %v1394_v31, %v3194_v54  ;;  %v2094_v39 = vpop.f32.mrb[19].mxu1  ;;  %v2264_v54 = vpop.permute.xlu0 %2263 }
 0x5fb   : > { %v2266_v55 = vunpack.i.h.bf16 %v2264_v54  ;;  %v2265_v56 = vunpack.i.l.bf16 %v2264_v54 }
 0x5fc   : > { %1400 = vst.msk [vmem:[#allocation5 + $0x18] sm:$0xff] %vm875_vm14, %v1399_v38  ;;  %1402 = vrot.lane.b32.xlu1 %v1399_v38, %s2683_s1 }
 0x600   : > { %1493 = vrot.lane.b32.xlu1 %v3085_v36, %s2682_s22 }
 0x603   : > { %v1412_v46 = vld [vmem:[#allocation5 + $0x18] sm:$0xff] }
 0x604   : > { %v1415_v47 = vpack.c.bf16 %v1412_v46, %v1411_v45 }
 0x606   : > { %2097 = vmatprep.subr.bf16.mxu0 %v1415_v47 }
 0x607   : > { %2098 = vmatpush3.bf16.msra.mxu0 %v1415_v47  ;;  %v1948_v47 = vld [vmem:[%s3348_s19] ss:$0 sm:$0xff] }
 0x66e   : > { %v1403_v48 = vpop.permute.xlu1 %1402 }
 0x66f   : > { %1405 = vst.msk [vmem:[#allocation5 + $0x20] sm:$0xff] %vm875_vm14, %v1403_v48 }
 0x672   : > { %v1494_v57 = vpop.permute.xlu1 %1493 }
 0x676   : > { %v1413_v49 = vld [vmem:[#allocation5 + $0x20] sm:$0xff] }
 0x677   : > { %v1416_v50 = vpack.c.bf16 %v1413_v49, %v1413_v49 }
 0x679   : > { %2133 = vmatprep.subr.msk.bf16.mxu0 %vm815_vm11, %v1416_v50  ;;  %v1433_v51 = vsel %vm815_vm11, %v1416_v50, 0 }
 0x67a   : > { %2100 = vmatpush3.bf16.msra.mxu0 %v1433_v51 }
 0x67b   : > { %2117 = vmatprep.subr.bf16.mxu0 %v2296_v5 }
 0x67d   : > { %2102 = vmatmul.mubr.msk.bf16.vlgmr.msra.gmra.mrb[16].mxu0 %vm1425_vm0, %v2291_v52 }
 0x67e   : > { %2118 = vmatpush3.bf16.msra.mxu0 %v2296_v5 }
 0x67f   : > { %2119 = vmatprep.subr.bf16.mxu0 %v2297_v37 }
 0x682   : > { %2120 = vmatpush3.bf16.msra.mxu0 %v2297_v37 }
 0x683   : > { %2121 = vmatprep.subr.bf16.mxu0 %v2298_v6 }
 0x686   : > { %2122 = vmatpush3.bf16.msra.mxu0 %v2298_v6 }
 0x687   : > { %2123 = vmatprep.subr.bf16.mxu0 %v2299_v7 }
 0x68a   : > { %2124 = vmatpush3.bf16.msra.mxu0 %v2299_v7 }
 0x750   : > { %v2103_v58 = vpop.f32.mrb[16].mxu0 }
 0x751   : > { %v1469_v59 = vpop.f32.mrb[17].mxu0  ;;  %v1500_v61 = vsel %vm875_vm14, %v2103_v58, %v1494_v57 }
 0x752   : > { %v2104_v60 = vpop.f32.mrb[18].mxu0  ;;  %v1498_v0 = vsel %vm875_vm14, %v1469_v59, %v2265_v56  ;;  %v1502_v4 = vpack.c.bf16 %v1500_v61, %v1500_v61 }
 0x753   : > { %v1472_v63 = vpop.f32.mrb[19].mxu0 }
 0x754   : > { %v1499_v1 = vsel %vm875_vm14, %v1472_v63, %v2266_v55 }
 0x755   : > { %v1501_v3 = vpack.c.bf16 %v1499_v1, %v1498_v0 }
 0x757   : > { %2113 = vmatprep.mubr.msk.bf16.mxu1 %vm937_vm15, %v1501_v3 }
 0x758   : > { %2114 = vmatmul.mubr.msk.bf16.vlgmr.msra.gmra.mrb[20].mxu1 %vm937_vm15, %v1502_v4 }
 0x82b   : > { %v2115_v9 = vpop.f32.mrb[20].mxu1 }
 0x82c   : > { %v1591_v10 = vadd.f32 %v2115_v9, %v1941_v8  ;;  %v1582_v11 = vpop.f32.mrb[21].mxu1 }
 0x82d   : > { %v1583_v12 = vadd.f32 %v1941_v8, %v1582_v11  ;;  %v2116_v13 = vpop.f32.mrb[22].mxu1 }
 0x82e   : > { %v1600_v14 = vmul.f32 1.442695, %v1591_v10  ;;  %v1585_v62 = vpop.f32.mrb[23].mxu1 }
 0x82f   : > { %v1596_v15 = vmul.f32 1.442695, %v1583_v12  ;;  %v1586_v16 = vadd.f32 %v1941_v8, %v1585_v62 }
 0x830   : > { %2312 = vpow2.f32 %v1600_v14 }
 0x831   : > { %2314 = vpow2.f32 %v1596_v15  ;;  %v1598_v17 = vmul.f32 1.442695, %v1586_v16 }
 0x833   : > { %2316 = vpow2.f32 %v1598_v17 }
 0x83a   : > { %v2313_v18 = vpop.eup %2312 }
 0x83b   : > { %v2315_v19 = vpop.eup %2314  ;;  %v1604_v20 = vadd.f32 2.0, %v2313_v18 }
 0x83c   : > { %v1602_v21 = vadd.f32 2.0, %v2315_v19 }
 0x83d   : > { %v2317_v22 = vpop.eup %2316  ;;  %v1607_v23 = vmul.f32 %v2313_v18, %v1604_v20 }
 0x83e   : > { %v1605_v2 = vmul.f32 %v2315_v19, %v1602_v21  ;;  %v1603_v24 = vadd.f32 2.0, %v2317_v22 }
 0x83f   : > { %v1610_v25 = vadd.f32 2.0, %v1607_v23 }
 0x840   : > { %v1608_v26 = vadd.f32 2.0, %v1605_v2  ;;  %v1606_v27 = vmul.f32 %v2317_v22, %v1603_v24 }
 0x841   : > { %2318 = vrcp.f32 %v1610_v25 }
 0x842   : > { %2320 = vrcp.f32 %v1608_v26  ;;  %v1609_v28 = vadd.f32 2.0, %v1606_v27 }
 0x844   : > { %2322 = vrcp.f32 %v1609_v28 }
 0x84b   : > { %v2319_v29 = vpop.eup %2318 }
 0x84c   : > { %v2321_v30 = vpop.eup %2320  ;;  %v1616_v31 = vmul.f32 2.0, %v2319_v29 }
 0x84d   : > { %v1612_v32 = vmul.f32 2.0, %v2321_v30 }
 0x84e   : > { %v2323_v33 = vpop.eup %2322  ;;  %v1619_v38 = vsub.f32 1.0, %v1616_v31 }
 0x84f   : > { %v1617_v39 = vsub.f32 1.0, %v1612_v32  ;;  %v1614_v40 = vmul.f32 2.0, %v2323_v33 }
 0x850   : > { %v1622_v42 = vmul.f32 %v1619_v38, %v1591_v10 }
 0x851   : > { %v1618_v41 = vsub.f32 1.0, %v1614_v40  ;;  %v1620_v43 = vmul.f32 %v1617_v39, %v1583_v12 }
 0x852   : > { %v1624_v46 = vpack.c.bf16 %v1622_v42, %v1622_v42 }
 0x853   : > { %v1621_v44 = vmul.f32 %v1618_v41, %v1586_v16 }
 0x855   : > { %v1623_v45 = vpack.c.bf16 %v1621_v44, %v1620_v43 }
 0x857   : > { %2125 = vmatprep.mubr.msk.bf16.mxu0 %vm937_vm15, %v1623_v45 }
 0x858   : > { %2126 = vmatmul.mubr.msk.bf16.vlgmr.msra.gmra.mrb[20].mxu0 %vm937_vm15, %v1624_v46 }
 0x92b   : > { %v2127_v48 = vpop.f32.mrb[20].mxu0 }
 0x92c   : > { %v1713_v49 = vadd.f32 %v2127_v48, %v1948_v47  ;;  %v1704_v50 = vpop.f32.mrb[21].mxu0 }
 0x92d   : > { %v1705_v51 = vadd.f32 %v1948_v47, %v1704_v50  ;;  %v2128_v52 = vpop.f32.mrb[22].mxu0 }
 0x92e   : > { %v1720_v53 = vadd.f32 %v1713_v49, %v3085_v36  ;;  %v1707_v54 = vpop.f32.mrb[23].mxu0 }
 0x92f   : > { %v1718_v55 = vadd.f32 %v1705_v51, %v3081_v34  ;;  %v1708_v56 = vadd.f32 %v1948_v47, %v1707_v54 }
 0x930   : > { %1723 = vst.msk [vmem:[#allocation23 + $0x10] sm:$0xff] %vm875_vm14, %v1720_v53 }
 0x931   : > { %1721 = vst.msk [vmem:[#allocation23] sm:$0xff] %vm875_vm14, %v1718_v55  ;;  %v1719_v57 = vadd.f32 %v1708_v56, %v3083_v35 }
 0x933   : > { %1722 = vst.msk [vmem:[#allocation23 + $0x8] sm:$0xff] %vm875_vm14, %v1719_v57 }
 0x934   : > { %2617 = shalt.err (!%p2614_p9)
}
 0x935   : > { %s3349_s1 = sld [smem:[#allocation40_spill]] }
 0x93b   : > { %s2618_s22 = scalar_lea.hbm %s3349_s1, 384 }
 0x93c   : > { %p2619_p10 = scmp.ne.s32.totalorder %s3349_s1, %s2618_s22  ;;  %p2624_p2 = scmp.lt.u32.totalorder %s2618_s22, %s3349_s1 }
 0x93e   : > { %p2620_p11 = pnand %p2619_p10, %p2229_p1 }
 0x940   : > { %p2621_p12 = pneg %p2620_p11 }
 0x942   : > { %p2626_p13 = pnand %p2624_p2, %p2621_p12 }
 0x944   : > { %2629 = shalt.err (!%p2626_p13)
}
 0x945   : > { %s2685_s0 = smov 128   ;;  %s2686_s27 = smov 8  }
 0x946   : > { %2175 = dma.vmem_to_hbm [thread:$0]  (%p2229_p1), %s1731_s13, 384, %s3349_s1, [#allocation8], %s2685_s0, %s2685_s0, %s2686_s27  }
 0x947   : > { %2659 = dma.done.wait (%p2229_p1), [#allocation8], 384  }
 0x948   : > { %2661 = vsyncadd (%p2229_p1), [#allocation8], 4294966912 }
 0x949 PF: > { %s3350_s23 = sld [smem:[#allocation31_spill]] }
 0x94f   : > { %s35_s27 = sadd.s32 1, %s3350_s23  }
 0x950   : > { %p32_p0 = scmp.ge.s32.totalorder %s35_s27, 4  }
 0x952   :  { %34 = sbr.rel (!%p32_p0) target bundleno = 17 (0x11), region = 161 }
 0x959   :  { %1746 = vsyncpa [#allocation7], 1 }
 0x95a   :  { %1748 = vsyncpa [#allocation7 + $0x1], 1 }
 0x95b   :  { %1749 = vsyncpa [#allocation10], 1 }
 0x95c   :  { %1750 = vsyncpa [#allocation13], 1 }
 0x95d   :  { %1751 = vsyncpa [#allocation16], 1 }
 0x95e   :  { %1752 = vsyncpa [#allocation19], 1 }
 0x95f   :  { %1753 = vsyncpa [#allocation22], 1 }
 0x960   :  { %1754 = vsyncpa [#allocation8], 1 }
 0x961   :  { %1756 = vsyncpa [#allocation8 + $0x1], 1 }

</bundles_post_ra>
